<compile_context>
chip_gen: v7x
topology: tpu7x:2x2x1
jax: 0.10.0
libtpu: 0.0.40
codegen_flags: <defaults>
</compile_context>

<pallas_src>
import functools

import jax
import jax.numpy as jnp
from jax import lax
from jax.experimental import pallas as pl
from jax.experimental.pallas import tpu as pltpu

FC_DEPTH = 5          # matches default fc_depth=5
POOL_IN = 3           # channels surviving the mean-pool stub
FEAT_IN = 400         # Kinetics-400 logits out of the backbone
HID = 200
OUT = 2

# Hardware-friendly padded sizes (lane axis multiples of 128; tiny pooled axis padded to 8).
POOL_IN_P = 8
FEAT_IN_P = 512
HID_P = 256
OUT_P = 128

TB_MAX = 1024         # max batch-tile rows; VMEM stays well under the 32 MiB scoped default
                      # (and v7x's 64 MiB) even with double-buffered input/output tiles.


def _round_up(x, m):
    return (x + m - 1) // m * m


def _cdiv(a, b):
    return -(-a // b)


# ---- static hardware dispatch (Python/compile-time only) --------------------------------
def _device_kind():
    try:
        return jax.devices()[0].device_kind.lower()
    except Exception:
        return ""


_KIND = _device_kind()
# Only the v7x family has 2 TensorCores per chip where CORE_PARALLEL splits the grid.
_MULTI_TC = any(tag in _KIND for tag in ("v7", "7x"))
_TC_PER_CHIP = 2 if _MULTI_TC else 1
_BATCH_SEMANTICS = (pltpu.CORE_PARALLEL,) if _MULTI_TC else ("parallel",)
# v5e and older have no bf16 VALU -> keep the bias+ReLU epilogue in f32 there.
_RELU_BF16 = not any(tag in _KIND for tag in ("v2", "v3", "v4", "v5"))


def _mvit_head_kernel(p_ref, bbw_ref, bbb_ref, w0_ref, b0_ref, wh_ref, bh_ref,
                      wl_ref, bl_ref, o_ref, *, relu_bf16):
    """Backbone-stub projection + fused 7-layer MLP head on one (tb, ...) batch tile.

    p_ref  : (tb, 8)       f32   mean-pooled video (cols 3:8 zero)
    bbw_ref: (8, 512)      f32,  bbb_ref: (1, 512) f32     ("layer 0" stub projection)
    w0_ref : (512, 256)    bf16, b0_ref : (1, 256) f32
    wh_ref : (5, 256, 256) bf16, bh_ref : (5, 1, 256) f32
    wl_ref : (256, 128)    bf16, bl_ref : (1, 128) f32
    o_ref  : (tb, 128)     bf16  (only cols 0:2 meaningful; lane-dense store)
    """

    def bias_relu(acc_f32, b_f32):
        # f32 accumulator + f32 bias.  ReLU after the bf16 downcast on bf16-VALU chips
        # (order is numerically equivalent for ReLU); f32 ReLU then cast on v5e.
        if relu_bf16:
            return jnp.maximum((acc_f32 + b_f32).astype(jnp.bfloat16), 0.0)
        return jnp.maximum(acc_f32 + b_f32, 0.0).astype(jnp.bfloat16)

    # "layer 0": backbone-stub projection, tiny K=8 matmul kept in f32.
    feats = jnp.dot(p_ref[...], bbw_ref[...],
                    preferred_element_type=jnp.float32) + bbb_ref[...]

    # Linear(400, 200) + ReLU   (padded 512 -> 256); bf16 MXU inputs, f32 accumulation.
    h = bias_relu(
        jnp.dot(feats.astype(jnp.bfloat16), w0_ref[...],
                preferred_element_type=jnp.float32),
        b0_ref[...])

    # fc_depth x (Linear(200, 200) + ReLU).  fori_loop bounds intermediate live ranges;
    # unroll=True keeps LLO scheduling visibility over the fixed 5 iterations.
    def body(i, h):
        acc = jnp.dot(h, wh_ref[i], preferred_element_type=jnp.float32)
        return bias_relu(acc, bh_ref[i])

    h = lax.fori_loop(0, FC_DEPTH, body, h, unroll=True)

    # Linear(200, 2)  (padded 256 -> 128), bias, no activation.
    out = jnp.dot(h, wl_ref[...], preferred_element_type=jnp.float32) + bl_ref[...]
    o_ref[...] = out.astype(o_ref.dtype)


@jax.jit
def mvit_head_pallas(pooled, bb_w, bb_b, w0, b0, wh, bh, wl, bl):
    """pooled: (B, 3) f32 mean-pooled video -> (B, 2) f32 logits."""
    B = pooled.shape[0]

    # Batch tiling: sublane granularity (16), not 128.  For large B pick the step count
    # minimizing padding; on multi-TC chips keep the grid a multiple of the TC count (>= 2)
    # so CORE_PARALLEL has work to split.
    n = max(1, _cdiv(B, TB_MAX))
    if _TC_PER_CHIP > 1 and B >= 16 * _TC_PER_CHIP:
        n = _round_up(max(n, _TC_PER_CHIP), _TC_PER_CHIP)
    tb = _round_up(_cdiv(B, n), 16)
    b_pad = tb * n
    grid = (n,)

    # Only the tiny pooled input is padded/materialized (32 B per row).
    pooled_p = jnp.zeros((b_pad, POOL_IN_P), jnp.float32)
    pooled_p = pooled_p.at[:B, :POOL_IN].set(pooled.astype(jnp.float32))

    def resident(shape):
        # Constant block index across the grid -> stays VMEM-resident, no per-step re-DMA.
        return pl.BlockSpec(shape, lambda i, _n=len(shape): (0,) * _n)

    flops = 2 * b_pad * (POOL_IN_P * FEAT_IN_P + FEAT_IN_P * HID_P
                         + FC_DEPTH * HID_P * HID_P + HID_P * OUT_P)
    bytes_accessed = (pooled_p.size * 4
                      + (w0.size + wh.size + wl.size) * 2
                      + (bb_w.size + bb_b.size + b0.size + bh.size + bl.size) * 4
                      + b_pad * OUT_P * 2)

    out = pl.pallas_call(
        functools.partial(_mvit_head_kernel, relu_bf16=_RELU_BF16),
        out_shape=jax.ShapeDtypeStruct((b_pad, OUT_P), jnp.bfloat16),
        grid=grid,
        in_specs=[
            pl.BlockSpec((tb, POOL_IN_P), lambda i: (i, 0)),   # pooled tile (pipelined)
            resident((POOL_IN_P, FEAT_IN_P)),                  # bb_w ("layer 0")
            resident((1, FEAT_IN_P)),                          # bb_b
            resident((FEAT_IN_P, HID_P)),                      # w0
            resident((1, HID_P)),                              # b0
            resident((FC_DEPTH, HID_P, HID_P)),                # wh
            resident((FC_DEPTH, 1, HID_P)),                    # bh
            resident((HID_P, OUT_P)),                          # wl
            resident((1, OUT_P)),                              # bl
        ],
        out_specs=pl.BlockSpec((tb, OUT_P), lambda i: (i, 0)),
        compiler_params=pltpu.CompilerParams(
            dimension_semantics=_BATCH_SEMANTICS),
        cost_estimate=pl.CostEstimate(
            flops=flops, transcendentals=0, bytes_accessed=bytes_accessed),
    )(pooled_p, bb_w, bb_b, w0, b0, wh, bh, wl, bl)

    return out[:B, :OUT].astype(jnp.float32)


def _linear_init(key, fan_in, fan_out):
    """Deterministic init mimicking torch.nn.Linear (uniform +-1/sqrt(fan_in))."""
    kw, kb = jax.random.split(key)
    bound = 1.0 / jnp.sqrt(jnp.float32(fan_in))
    w = jax.random.uniform(kw, (fan_in, fan_out), jnp.float32, -bound, bound)
    b = jax.random.uniform(kb, (1, fan_out), jnp.float32, -bound, bound)
    return w, b


def _pad2(w, rows, cols, dtype):
    """Zero-pad a 2-D array to (rows, cols) and cast (padding must stay exactly 0)."""
    out = jnp.zeros((rows, cols), dtype)
    return out.at[: w.shape[0], : w.shape[1]].set(w.astype(dtype))


def init_params(key):
    keys = jax.random.split(key, FC_DEPTH + 3)
    # backbone stand-in projection ("layer 0" inside the kernel)
    bb_w, bb_b = _linear_init(keys[0], POOL_IN, FEAT_IN)
    # head (logical shapes), then zero-padded to MXU/vreg-friendly packed shapes.
    w0, b0 = _linear_init(keys[1], FEAT_IN, HID)
    wh_list, bh_list = [], []
    for d in range(FC_DEPTH):
        w, b = _linear_init(keys[2 + d], HID, HID)
        wh_list.append(w)
        bh_list.append(b)
    wl, bl = _linear_init(keys[2 + FC_DEPTH], HID, OUT)

    return dict(
        bb_w=_pad2(bb_w, POOL_IN_P, FEAT_IN_P, jnp.float32),
        bb_b=_pad2(bb_b, 1, FEAT_IN_P, jnp.float32),
        w0=_pad2(w0, FEAT_IN_P, HID_P, jnp.bfloat16),
        b0=_pad2(b0, 1, HID_P, jnp.float32),
        wh=jnp.stack([_pad2(w, HID_P, HID_P, jnp.bfloat16) for w in wh_list], axis=0),
        bh=jnp.stack([_pad2(b, 1, HID_P, jnp.float32) for b in bh_list], axis=0),
        wl=_pad2(wl, HID_P, OUT_P, jnp.bfloat16),
        bl=_pad2(bl, 1, OUT_P, jnp.float32),
    )


def mvit_forward(params, x):
    """x: [B, 3, T, H, W] float32 video clip (NCTHW, as PyTorch expects)."""
    # ---- backbone stand-in: mean-pool in plain JAX; its linear projection runs inside the
    # Pallas kernel as "layer 0" so no [B, 400] activation ever round-trips through HBM ----
    # TODO(synk): replace with real mvit_base_16x4 backbone if weights/architecture available.
    pooled = jnp.mean(x, axis=(2, 3, 4))                    # [B, 3]
    return mvit_head_pallas(pooled, params["bb_w"], params["bb_b"],
                            params["w0"], params["b0"],
                            params["wh"], params["bh"],
                            params["wl"], params["bl"])     # [B, 2] f32


if __name__ == "__main__":
    key = jax.random.PRNGKey(0)
    pkey, xkey = jax.random.split(key)
    params = init_params(pkey)

    # Small video-like input consistent with the module's NCTHW convention.
    B, C, T, H, W = 2, 3, 4, 16, 16
    x = jax.random.normal(xkey, (B, C, T, H, W), jnp.float32)

    out = mvit_forward(params, x)
    out = jax.block_until_ready(out)
    assert out.shape == (B, 2), out.shape
    assert out.dtype == jnp.float32
    print("KERNEL_OK")
</pallas_src>

<mosaic_0001>
module attributes {stable_mosaic.version = 11 : i64} {
  func.func @_mvit_head_kernel(%arg0: i32, %arg1: memref<16x8xf32, #tpu.memory_space<vmem>>, %arg2: memref<8x512xf32, #tpu.memory_space<vmem>>, %arg3: memref<1x512xf32, #tpu.memory_space<vmem>>, %arg4: memref<512x256xbf16, #tpu.memory_space<vmem>>, %arg5: memref<1x256xf32, #tpu.memory_space<vmem>>, %arg6: memref<5x256x256xbf16, #tpu.memory_space<vmem>>, %arg7: memref<5x1x256xf32, #tpu.memory_space<vmem>>, %arg8: memref<256x128xbf16, #tpu.memory_space<vmem>>, %arg9: memref<1x128xf32, #tpu.memory_space<vmem>>, %arg10: memref<16x128xbf16, #tpu.memory_space<vmem>>) attributes {dimension_semantics = [#tpu.dimension_semantics<parallel>], iteration_bounds = array<i64: 1>, scalar_prefetch = 0 : i64, scratch_operands = 0 : i64, tpu.core_type = #tpu.core_type<tc>, window_params = [{transform_indices = @transform_0, window_bounds = array<i64: 16, 8>}, {pipeline_mode = #tpu.pipeline_mode<synchronous>, transform_indices = @transform_1, window_bounds = array<i64: 8, 512>}, {pipeline_mode = #tpu.pipeline_mode<synchronous>, transform_indices = @transform_2, window_bounds = array<i64: 1, 512>}, {pipeline_mode = #tpu.pipeline_mode<synchronous>, transform_indices = @transform_3, window_bounds = array<i64: 512, 256>}, {pipeline_mode = #tpu.pipeline_mode<synchronous>, transform_indices = @transform_4, window_bounds = array<i64: 1, 256>}, {pipeline_mode = #tpu.pipeline_mode<synchronous>, transform_indices = @transform_5, window_bounds = array<i64: 5, 256, 256>}, {pipeline_mode = #tpu.pipeline_mode<synchronous>, transform_indices = @transform_6, window_bounds = array<i64: 5, 1, 256>}, {pipeline_mode = #tpu.pipeline_mode<synchronous>, transform_indices = @transform_7, window_bounds = array<i64: 256, 128>}, {pipeline_mode = #tpu.pipeline_mode<synchronous>, transform_indices = @transform_8, window_bounds = array<i64: 1, 128>}, {transform_indices = @transform_9, window_bounds = array<i64: 16, 128>}]} {
    %c0 = arith.constant 0 : index
    %c0_0 = arith.constant 0 : index
    %0 = vector.load %arg1[%c0, %c0_0] : memref<16x8xf32, #tpu.memory_space<vmem>>, vector<16x8xf32>
    %c0_1 = arith.constant 0 : index
    %c0_2 = arith.constant 0 : index
    %1 = vector.load %arg2[%c0_1, %c0_2] : memref<8x512xf32, #tpu.memory_space<vmem>>, vector<8x512xf32>
    %cst = arith.constant dense<0.000000e+00> : vector<16x512xf32>
    %2 = tpu.matmul %0, %1, %cst {dimension_numbers = #tpu.dot_dimension_numbers<[1], [0], [0], [1], [0, 0, 1, 1], [], []>} : vector<16x8xf32>, vector<8x512xf32>, vector<16x512xf32> -> vector<16x512xf32>
    %c0_3 = arith.constant 0 : index
    %c0_4 = arith.constant 0 : index
    %3 = vector.load %arg3[%c0_3, %c0_4] : memref<1x512xf32, #tpu.memory_space<vmem>>, vector<1x512xf32>
    %4 = vector.broadcast %3 : vector<1x512xf32> to vector<16x512xf32>
    %5 = arith.addf %2, %4 : vector<16x512xf32>
    %6 = arith.truncf %5 : vector<16x512xf32> to vector<16x512xbf16>
    %c0_5 = arith.constant 0 : index
    %c0_6 = arith.constant 0 : index
    %7 = vector.load %arg4[%c0_5, %c0_6] : memref<512x256xbf16, #tpu.memory_space<vmem>>, vector<512x256xbf16>
    %cst_7 = arith.constant dense<0.000000e+00> : vector<16x256xf32>
    %8 = tpu.matmul %6, %7, %cst_7 {dimension_numbers = #tpu.dot_dimension_numbers<[1], [0], [0], [1], [0, 0, 1, 1], [], []>} : vector<16x512xbf16>, vector<512x256xbf16>, vector<16x256xf32> -> vector<16x256xf32>
    %c0_8 = arith.constant 0 : index
    %c0_9 = arith.constant 0 : index
    %9 = vector.load %arg5[%c0_8, %c0_9] : memref<1x256xf32, #tpu.memory_space<vmem>>, vector<1x256xf32>
    %10 = vector.broadcast %9 : vector<1x256xf32> to vector<16x256xf32>
    %11 = arith.addf %8, %10 : vector<16x256xf32>
    %12 = arith.truncf %11 : vector<16x256xf32> to vector<16x256xbf16>
    %cst_10 = arith.constant 0.000000e+00 : bf16
    %13 = vector.broadcast %cst_10 : bf16 to vector<16x256xbf16>
    %14 = arith.maximumf %12, %13 : vector<16x256xbf16>
    %c0_i32 = arith.constant 0 : i32
    %15 = arith.index_cast %c0_i32 : i32 to index
    %c0_11 = arith.constant 0 : index
    %c0_12 = arith.constant 0 : index
    %16 = vector.load %arg6[%15, %c0_11, %c0_12] : memref<5x256x256xbf16, #tpu.memory_space<vmem>>, vector<1x256x256xbf16>
    %17 = vector.shape_cast %16 : vector<1x256x256xbf16> to vector<256x256xbf16>
    %cst_13 = arith.constant dense<0.000000e+00> : vector<16x256xf32>
    %18 = tpu.matmul %14, %17, %cst_13 {dimension_numbers = #tpu.dot_dimension_numbers<[1], [0], [0], [1], [0, 0, 1, 1], [], []>} : vector<16x256xbf16>, vector<256x256xbf16>, vector<16x256xf32> -> vector<16x256xf32>
    %19 = arith.index_cast %c0_i32 : i32 to index
    %c0_14 = arith.constant 0 : index
    %c0_15 = arith.constant 0 : index
    %20 = vector.load %arg7[%19, %c0_14, %c0_15] : memref<5x1x256xf32, #tpu.memory_space<vmem>>, vector<1x1x256xf32>
    %21 = vector.shape_cast %20 : vector<1x1x256xf32> to vector<1x256xf32>
    %22 = vector.broadcast %21 : vector<1x256xf32> to vector<16x256xf32>
    %23 = arith.addf %18, %22 : vector<16x256xf32>
    %24 = arith.truncf %23 : vector<16x256xf32> to vector<16x256xbf16>
    %cst_16 = arith.constant 0.000000e+00 : bf16
    %25 = vector.broadcast %cst_16 : bf16 to vector<16x256xbf16>
    %26 = arith.maximumf %24, %25 : vector<16x256xbf16>
    %c1_i32 = arith.constant 1 : i32
    %27 = arith.index_cast %c1_i32 : i32 to index
    %c0_17 = arith.constant 0 : index
    %c0_18 = arith.constant 0 : index
    %28 = vector.load %arg6[%27, %c0_17, %c0_18] : memref<5x256x256xbf16, #tpu.memory_space<vmem>>, vector<1x256x256xbf16>
    %29 = vector.shape_cast %28 : vector<1x256x256xbf16> to vector<256x256xbf16>
    %cst_19 = arith.constant dense<0.000000e+00> : vector<16x256xf32>
    %30 = tpu.matmul %26, %29, %cst_19 {dimension_numbers = #tpu.dot_dimension_numbers<[1], [0], [0], [1], [0, 0, 1, 1], [], []>} : vector<16x256xbf16>, vector<256x256xbf16>, vector<16x256xf32> -> vector<16x256xf32>
    %31 = arith.index_cast %c1_i32 : i32 to index
    %c0_20 = arith.constant 0 : index
    %c0_21 = arith.constant 0 : index
    %32 = vector.load %arg7[%31, %c0_20, %c0_21] : memref<5x1x256xf32, #tpu.memory_space<vmem>>, vector<1x1x256xf32>
    %33 = vector.shape_cast %32 : vector<1x1x256xf32> to vector<1x256xf32>
    %34 = vector.broadcast %33 : vector<1x256xf32> to vector<16x256xf32>
    %35 = arith.addf %30, %34 : vector<16x256xf32>
    %36 = arith.truncf %35 : vector<16x256xf32> to vector<16x256xbf16>
    %cst_22 = arith.constant 0.000000e+00 : bf16
    %37 = vector.broadcast %cst_22 : bf16 to vector<16x256xbf16>
    %38 = arith.maximumf %36, %37 : vector<16x256xbf16>
    %c2_i32 = arith.constant 2 : i32
    %39 = arith.index_cast %c2_i32 : i32 to index
    %c0_23 = arith.constant 0 : index
    %c0_24 = arith.constant 0 : index
    %40 = vector.load %arg6[%39, %c0_23, %c0_24] : memref<5x256x256xbf16, #tpu.memory_space<vmem>>, vector<1x256x256xbf16>
    %41 = vector.shape_cast %40 : vector<1x256x256xbf16> to vector<256x256xbf16>
    %cst_25 = arith.constant dense<0.000000e+00> : vector<16x256xf32>
    %42 = tpu.matmul %38, %41, %cst_25 {dimension_numbers = #tpu.dot_dimension_numbers<[1], [0], [0], [1], [0, 0, 1, 1], [], []>} : vector<16x256xbf16>, vector<256x256xbf16>, vector<16x256xf32> -> vector<16x256xf32>
    %43 = arith.index_cast %c2_i32 : i32 to index
    %c0_26 = arith.constant 0 : index
    %c0_27 = arith.constant 0 : index
    %44 = vector.load %arg7[%43, %c0_26, %c0_27] : memref<5x1x256xf32, #tpu.memory_space<vmem>>, vector<1x1x256xf32>
    %45 = vector.shape_cast %44 : vector<1x1x256xf32> to vector<1x256xf32>
    %46 = vector.broadcast %45 : vector<1x256xf32> to vector<16x256xf32>
    %47 = arith.addf %42, %46 : vector<16x256xf32>
    %48 = arith.truncf %47 : vector<16x256xf32> to vector<16x256xbf16>
    %cst_28 = arith.constant 0.000000e+00 : bf16
    %49 = vector.broadcast %cst_28 : bf16 to vector<16x256xbf16>
    %50 = arith.maximumf %48, %49 : vector<16x256xbf16>
    %c3_i32 = arith.constant 3 : i32
    %51 = arith.index_cast %c3_i32 : i32 to index
    %c0_29 = arith.constant 0 : index
    %c0_30 = arith.constant 0 : index
    %52 = vector.load %arg6[%51, %c0_29, %c0_30] : memref<5x256x256xbf16, #tpu.memory_space<vmem>>, vector<1x256x256xbf16>
    %53 = vector.shape_cast %52 : vector<1x256x256xbf16> to vector<256x256xbf16>
    %cst_31 = arith.constant dense<0.000000e+00> : vector<16x256xf32>
    %54 = tpu.matmul %50, %53, %cst_31 {dimension_numbers = #tpu.dot_dimension_numbers<[1], [0], [0], [1], [0, 0, 1, 1], [], []>} : vector<16x256xbf16>, vector<256x256xbf16>, vector<16x256xf32> -> vector<16x256xf32>
    %55 = arith.index_cast %c3_i32 : i32 to index
    %c0_32 = arith.constant 0 : index
    %c0_33 = arith.constant 0 : index
    %56 = vector.load %arg7[%55, %c0_32, %c0_33] : memref<5x1x256xf32, #tpu.memory_space<vmem>>, vector<1x1x256xf32>
    %57 = vector.shape_cast %56 : vector<1x1x256xf32> to vector<1x256xf32>
    %58 = vector.broadcast %57 : vector<1x256xf32> to vector<16x256xf32>
    %59 = arith.addf %54, %58 : vector<16x256xf32>
    %60 = arith.truncf %59 : vector<16x256xf32> to vector<16x256xbf16>
    %cst_34 = arith.constant 0.000000e+00 : bf16
    %61 = vector.broadcast %cst_34 : bf16 to vector<16x256xbf16>
    %62 = arith.maximumf %60, %61 : vector<16x256xbf16>
    %c4_i32 = arith.constant 4 : i32
    %63 = arith.index_cast %c4_i32 : i32 to index
    %c0_35 = arith.constant 0 : index
    %c0_36 = arith.constant 0 : index
    %64 = vector.load %arg6[%63, %c0_35, %c0_36] : memref<5x256x256xbf16, #tpu.memory_space<vmem>>, vector<1x256x256xbf16>
    %65 = vector.shape_cast %64 : vector<1x256x256xbf16> to vector<256x256xbf16>
    %cst_37 = arith.constant dense<0.000000e+00> : vector<16x256xf32>
    %66 = tpu.matmul %62, %65, %cst_37 {dimension_numbers = #tpu.dot_dimension_numbers<[1], [0], [0], [1], [0, 0, 1, 1], [], []>} : vector<16x256xbf16>, vector<256x256xbf16>, vector<16x256xf32> -> vector<16x256xf32>
    %67 = arith.index_cast %c4_i32 : i32 to index
    %c0_38 = arith.constant 0 : index
    %c0_39 = arith.constant 0 : index
    %68 = vector.load %arg7[%67, %c0_38, %c0_39] : memref<5x1x256xf32, #tpu.memory_space<vmem>>, vector<1x1x256xf32>
    %69 = vector.shape_cast %68 : vector<1x1x256xf32> to vector<1x256xf32>
    %70 = vector.broadcast %69 : vector<1x256xf32> to vector<16x256xf32>
    %71 = arith.addf %66, %70 : vector<16x256xf32>
    %72 = arith.truncf %71 : vector<16x256xf32> to vector<16x256xbf16>
    %cst_40 = arith.constant 0.000000e+00 : bf16
    %73 = vector.broadcast %cst_40 : bf16 to vector<16x256xbf16>
    %74 = arith.maximumf %72, %73 : vector<16x256xbf16>
    %c5_i32 = arith.constant 5 : i32
    %c0_41 = arith.constant 0 : index
    %c0_42 = arith.constant 0 : index
    %75 = vector.load %arg8[%c0_41, %c0_42] : memref<256x128xbf16, #tpu.memory_space<vmem>>, vector<256x128xbf16>
    %cst_43 = arith.constant dense<0.000000e+00> : vector<16x128xf32>
    %76 = tpu.matmul %74, %75, %cst_43 {dimension_numbers = #tpu.dot_dimension_numbers<[1], [0], [0], [1], [0, 0, 1, 1], [], []>} : vector<16x256xbf16>, vector<256x128xbf16>, vector<16x128xf32> -> vector<16x128xf32>
    %c0_44 = arith.constant 0 : index
    %c0_45 = arith.constant 0 : index
    %77 = vector.load %arg9[%c0_44, %c0_45] : memref<1x128xf32, #tpu.memory_space<vmem>>, vector<1x128xf32>
    %78 = vector.broadcast %77 : vector<1x128xf32> to vector<16x128xf32>
    %79 = arith.addf %76, %78 : vector<16x128xf32>
    %80 = arith.truncf %79 : vector<16x128xf32> to vector<16x128xbf16>
    %c0_46 = arith.constant 0 : index
    %c0_47 = arith.constant 0 : index
    %81 = vector.load %arg10[%c0_46, %c0_47] : memref<16x128xbf16, #tpu.memory_space<vmem>>, vector<16x128xbf16>
    tpu.vector_store %arg10[%c0_46, %c0_47], %80 {strides = array<i32>} : memref<16x128xbf16, #tpu.memory_space<vmem>>, vector<16x128xbf16>,
    return
  }
  func.func @transform_0(%arg0: i32) -> (i32, i32) {
    %c0_i32 = arith.constant 0 : i32
    %c0_i32_0 = arith.constant 0 : i32
    return %arg0, %c0_i32 : i32, i32
  }
  func.func @transform_1(%arg0: i32) -> (i32, i32) {
    %c0_i32 = arith.constant 0 : i32
    %c0_i32_0 = arith.constant 0 : i32
    %c0_i32_1 = arith.constant 0 : i32
    return %c0_i32, %c0_i32_0 : i32, i32
  }
  func.func @transform_2(%arg0: i32) -> (i32, i32) {
    %c0_i32 = arith.constant 0 : i32
    %c0_i32_0 = arith.constant 0 : i32
    %c0_i32_1 = arith.constant 0 : i32
    return %c0_i32, %c0_i32_0 : i32, i32
  }
  func.func @transform_3(%arg0: i32) -> (i32, i32) {
    %c0_i32 = arith.constant 0 : i32
    %c0_i32_0 = arith.constant 0 : i32
    %c0_i32_1 = arith.constant 0 : i32
    return %c0_i32, %c0_i32_0 : i32, i32
  }
  func.func @transform_4(%arg0: i32) -> (i32, i32) {
    %c0_i32 = arith.constant 0 : i32
    %c0_i32_0 = arith.constant 0 : i32
    %c0_i32_1 = arith.constant 0 : i32
    return %c0_i32, %c0_i32_0 : i32, i32
  }
  func.func @transform_5(%arg0: i32) -> (i32, i32, i32) {
    %c0_i32 = arith.constant 0 : i32
    %c0_i32_0 = arith.constant 0 : i32
    %c0_i32_1 = arith.constant 0 : i32
    %c0_i32_2 = arith.constant 0 : i32
    return %c0_i32, %c0_i32_0, %c0_i32_1 : i32, i32, i32
  }
  func.func @transform_6(%arg0: i32) -> (i32, i32, i32) {
    %c0_i32 = arith.constant 0 : i32
    %c0_i32_0 = arith.constant 0 : i32
    %c0_i32_1 = arith.constant 0 : i32
    %c0_i32_2 = arith.constant 0 : i32
    return %c0_i32, %c0_i32_0, %c0_i32_1 : i32, i32, i32
  }
  func.func @transform_7(%arg0: i32) -> (i32, i32) {
    %c0_i32 = arith.constant 0 : i32
    %c0_i32_0 = arith.constant 0 : i32
    %c0_i32_1 = arith.constant 0 : i32
    return %c0_i32, %c0_i32_0 : i32, i32
  }
  func.func @transform_8(%arg0: i32) -> (i32, i32) {
    %c0_i32 = arith.constant 0 : i32
    %c0_i32_0 = arith.constant 0 : i32
    %c0_i32_1 = arith.constant 0 : i32
    return %c0_i32, %c0_i32_0 : i32, i32
  }
  func.func @transform_9(%arg0: i32) -> (i32, i32) {
    %c0_i32 = arith.constant 0 : i32
    %c0_i32_0 = arith.constant 0 : i32
    return %arg0, %c0_i32 : i32, i32
  }
}

</mosaic_0001>

<bundles_post_ra>
// kernel: mvit_head_pallas.1
= control target key start
LH: loop header
LB: loop body
LE: loop exit
PB: predicated region body
PF: predicated region fallthrough
CT: control target
= control target key end

     0   :  { %14 = vsyncpa [#allocation3], 0  ;;  %s3149_s0 = inlined_call_operand.vmem [shape: f32[16,8], index: 0, kind: input, shape index: {}]   ;;  %s3150_s1 = inlined_call_operand.hbm [shape: f32[8,512], index: 1, kind: input, shape index: {}]   ;;  %s3151_s2 = inlined_call_operand.vmem [shape: f32[1,512], index: 2, kind: input, shape index: {}]   ;;  %s3152_s3 = inlined_call_operand.hbm [shape: bf16[512,256], index: 3, kind: input, shape index: {}]   ;;  %s3153_s4 = inlined_call_operand.vmem [shape: f32[1,256], index: 4, kind: input, shape index: {}]   ;;  %s3154_s5 = inlined_call_operand.hbm [shape: bf16[5,256,256], index: 5, kind: input, shape index: {}]   ;;  %s3155_s6 = inlined_call_operand.vmem [shape: f32[5,1,256], index: 6, kind: input, shape index: {}]   ;;  %s3156_s7 = inlined_call_operand.hbm [shape: bf16[256,128], index: 7, kind: input, shape index: {}]   ;;  %s3157_s8 = inlined_call_operand.vmem [shape: f32[1,128], index: 8, kind: input, shape index: {}]   ;;  %s3158_s9 = inlined_call_operand.vmem [shape: bf16[16,128], index: 9, kind: output, shape index: {}]  }
   0x1   :  { %15 = vsyncpa [#allocation5], 0 }
   0x2   :  { %16 = vsyncpa [#allocation8], 0  ;;  %s2965_s30 = smov [#allocation4]   ;;  %s2871_s13 = scalar_lea.hbm %s3152_s3, 8192 }
   0x3   :  { %s36_s10 = sshll.u32 %s2965_s30, 4  ;;  %p2872_p0 = scmp.ne.s32.totalorder %s3152_s3, %s2871_s13  ;;  %s37_s10 = int_to_ptr.vmem [resolvable:$true] %s36_s10 }
   0x4   :  { %p2875_p1 = scmp.lt.u32.totalorder %s2871_s13, %s3152_s3 }
   0x6   :  { %p2877_p2 = pnand %p2875_p1, %p2872_p0 }
   0x8   :  { %2880 = shalt.err (!%p2877_p2)
}
   0x9   :  { %s2881_s18 = scalar_lea.vmem %s37_s10, 8192  ;;  %p2886_p4 = scmp.lt.s32.totalorder %s37_s10, %s37_s10 }
   0xa   :  { %p2882_p3 = scmp.ne.s32.totalorder %s37_s10, %s2881_s18  ;;  %p2887_p5 = scmp.lt.s32.totalorder %s2881_s18, %s2881_s18 }
   0xc   :  { %p2888_p6 = por %p2887_p5, %p2886_p4 }
   0xe   :  { %p2889_p7 = pnand %p2888_p6, %p2882_p3 }
  0x10   :  { %2892 = shalt.err (!%p2889_p7)
}
  0x11   :  { %s2966_s19 = smov 128   ;;  %s2967_s20 = smov 8  }
  0x12   :  { %42 = dma.hbm_to_vmem [thread:$0]  %s3152_s3, 8192, %s37_s10, [#allocation5], %s2966_s19, %s2966_s19, %s2967_s20  }
  0x13   :  { %s2968_s23 = smov [#allocation2]   ;;  %s2969_s25 = smov [#allocation6]  }
  0x14   :  { %s25_s24 = sshll.u32 %s2968_s23, 4  ;;  %s50_s26 = sshll.u32 %s2969_s25, 4  ;;  %s26_s24 = int_to_ptr.vmem [resolvable:$true] %s25_s24  ;;  %s51_s26 = int_to_ptr.vmem [resolvable:$true] %s50_s26 }
  0x15   :  { %s2893_s29 = scalar_lea.hbm %s3150_s1, 512 }
  0x16   :  { %p2894_p8 = scmp.ne.s32.totalorder %s3150_s1, %s2893_s29  ;;  %p2897_p9 = scmp.lt.u32.totalorder %s2893_s29, %s3150_s1 }
  0x18   :  { %p2899_p10 = pnand %p2897_p9, %p2894_p8 }
  0x1a   :  { %2902 = shalt.err (!%p2899_p10)
}
  0x1b   :  { %s2903_s3 = scalar_lea.vmem %s26_s24, 512  ;;  %p2908_p12 = scmp.lt.s32.totalorder %s26_s24, %s26_s24 }
  0x1c   :  { %p2904_p11 = scmp.ne.s32.totalorder %s26_s24, %s2903_s3  ;;  %p2909_p13 = scmp.lt.s32.totalorder %s2903_s3, %s2903_s3 }
  0x1e   :  { %p2910_p0 = por %p2909_p13, %p2908_p12 }
  0x20   :  { %p2911_p1 = pnand %p2910_p0, %p2904_p11 }
  0x22   :  { %2914 = shalt.err (!%p2911_p1)
}
  0x23   :  { %28 = dma.hbm_to_vmem [thread:$0]  %s3150_s1, 512, %s26_s24, [#allocation3]  }
  0x24   :  { %s2915_s17 = scalar_lea.hbm %s3154_s5, 20480 }
  0x25   :  { %p2916_p2 = scmp.ne.s32.totalorder %s3154_s5, %s2915_s17  ;;  %p2919_p3 = scmp.lt.u32.totalorder %s2915_s17, %s3154_s5 }
  0x27   :  { %p2921_p4 = pnand %p2919_p3, %p2916_p2 }
  0x29   :  { %2924 = shalt.err (!%p2921_p4)
}
  0x2a   :  { %s2925_s25 = scalar_lea.vmem %s51_s26, 20480  ;;  %p2930_p6 = scmp.lt.s32.totalorder %s51_s26, %s51_s26 }
  0x2b   :  { %p2926_p5 = scmp.ne.s32.totalorder %s51_s26, %s2925_s25  ;;  %p2931_p7 = scmp.lt.s32.totalorder %s2925_s25, %s2925_s25 }
  0x2d   :  { %p2932_p8 = por %p2931_p7, %p2930_p6 }
  0x2f   :  { %p2933_p9 = pnand %p2932_p8, %p2926_p5 }
  0x31   :  { %2936 = shalt.err (!%p2933_p9)
}
  0x32   :  { %56 = dma.hbm_to_vmem [thread:$0]  %s3154_s5, 20480, %s51_s26, [#allocation5], %s2966_s19, %s2966_s19, %s2967_s20  }
  0x33   :  { %s2970_s27 = smov [#allocation7]   ;;  %s2937_s11 = scalar_lea.hbm %s3156_s7, 2048 }
  0x34   :  { %s64_s28 = sshll.u32 %s2970_s27, 4  ;;  %p2938_p10 = scmp.ne.s32.totalorder %s3156_s7, %s2937_s11  ;;  %s65_s28 = int_to_ptr.vmem [resolvable:$true] %s64_s28 }
  0x35   :  { %p2941_p11 = scmp.lt.u32.totalorder %s2937_s11, %s3156_s7 }
  0x37   :  { %p2943_p12 = pnand %p2941_p11, %p2938_p10 }
  0x39   :  { %2946 = shalt.err (!%p2943_p12)
}
  0x3a   :  { %s2947_s14 = scalar_lea.vmem %s65_s28, 2048  ;;  %p2952_p0 = scmp.lt.s32.totalorder %s65_s28, %s65_s28 }
  0x3b   :  { %p2948_p13 = scmp.ne.s32.totalorder %s65_s28, %s2947_s14  ;;  %p2953_p1 = scmp.lt.s32.totalorder %s2947_s14, %s2947_s14 }
  0x3d   :  { %p2954_p2 = por %p2953_p1, %p2952_p0 }
  0x3f   :  { %p2955_p3 = pnand %p2954_p2, %p2948_p13 }
  0x41   :  { %2958 = shalt.err (!%p2955_p3)
}
  0x42   :  { %s2971_s5 = smov 64   ;;  %s2972_s19 = smov 4  }
  0x43   :  { %70 = dma.hbm_to_vmem [thread:$0]  %s3156_s7, 2048, %s65_s28, [#allocation8], %s2971_s5, %s2971_s5, %s2972_s19  }
  0x44   :  { %2959 = dma.done.wait [#allocation3], 512  }
  0x45   :  { %2960 = vsyncadd [#allocation3], 4294966784 }
  0x46   :  { %2961 = dma.done.wait [#allocation5], 28672  }
  0x47   :  { %2962 = vsyncadd [#allocation5], 4294938624 }
  0x48   :  { %2963 = dma.done.wait [#allocation8], 2048  }
  0x49   :  { %2964 = vsyncadd [#allocation8], 4294965248  ;;  %v2973_v0 = vmov 0.0   ;;  %v89_v1 = vld [vmem:[#allocation2 + $0x8] sm:$0xff]  ;;  %v88_v2 = vld [vmem:[#allocation2] sm:$0xff]  ;;  %vm114_vm0 = vcmask 64512   ;;  %v94_v63 = vlaneseq }
  0x4a   :  { %185 = vmatprep.mubr.f32.mxu1 %v2973_v0  ;;  %v86_v3 = vld [vmem:[%s3149_s0] sm:$0xff]  ;;  %121 = vmatprep.subr.mxu1 %v89_v1  ;;  %v91_v4 = vld [vmem:[#allocation2 + $0x18] sm:$0xff]  ;;  %v90_v5 = vld [vmem:[#allocation2 + $0x10] sm:$0xff] }
  0x4b   :  { %122 = vmatpush1.msra.mxu1 %v88_v2  ;;  %v2519_v6 = vld [vmem:[#allocation4 + $0x4] ss:$8 sps:$4 sm:$0xff]   ;;  %v2521_v7 = vld [vmem:[#allocation4] ss:$8 sps:$4 sm:$0xff]   ;;  %v2522_v9 = vld [vmem:[#allocation4 + $0x14] ss:$8 sps:$4 sm:$0xff]  }
  0x4c   :  { %2221 = vmatmul.mubr.msk.f32.vlgmr.msra.gmra.mrb[0].mxu1 %vm114_vm0, %v86_v3  ;;  %198 = vmatprep.subr.mxu1 %v91_v4  ;;  %v87_v8 = vld [vmem:[%s3149_s0 + $0x8] sm:$0xff]  ;;  %v2524_v10 = vld [vmem:[#allocation4 + $0x10] ss:$8 sps:$4 sm:$0xff]   ;;  %v2528_v13 = vld [vmem:[#allocation4 + $0x34] ss:$8 sps:$4 sm:$0xff]   ;;  %v95_v2 = vshrl.u32 %v94_v63, 7 }
  0x4d   :  { %191 = vmatprep.mubr.f32.mxu1 %v2973_v0  ;;  %199 = vmatpush1.msra.mxu1 %v90_v5  ;;  %v2525_v11 = vld [vmem:[#allocation4 + $0x24] ss:$8 sps:$4 sm:$0xff]   ;;  %v2527_v12 = vld [vmem:[#allocation4 + $0x20] ss:$8 sps:$4 sm:$0xff]   ;;  %v2530_v14 = vld [vmem:[#allocation4 + $0x30] ss:$8 sps:$4 sm:$0xff]  }
  0x4e   :  { %675 = vmatprep.subr.bf16.mxu0 %v2519_v6  ;;  %v2531_v15 = vld [vmem:[#allocation4 + $0x44] ss:$8 sps:$4 sm:$0xff]   ;;  %v2533_v16 = vld [vmem:[#allocation4 + $0x40] ss:$8 sps:$4 sm:$0xff]   ;;  %v2534_v17 = vld [vmem:[#allocation4 + $0x54] ss:$8 sps:$4 sm:$0xff]  }
  0x4f   :  { %676 = vmatpush1.bf16.msra.mxu0 %v2521_v7  ;;  %v2536_v18 = vld [vmem:[#allocation4 + $0x50] ss:$8 sps:$4 sm:$0xff]   ;;  %v2537_v19 = vld [vmem:[#allocation4 + $0x64] ss:$8 sps:$4 sm:$0xff]   ;;  %v2539_v20 = vld [vmem:[#allocation4 + $0x60] ss:$8 sps:$4 sm:$0xff]  }
  0x50   :  { %2222 = vmatmul.mubr.msk.f32.gmra.mrb[2].mxu1 %vm114_vm0, %v87_v8  ;;  %677 = vmatprep.subr.bf16.mxu0 %v2522_v9  ;;  %v2540_v21 = vld [vmem:[#allocation4 + $0x74] ss:$8 sps:$4 sm:$0xff]   ;;  %v2542_v22 = vld [vmem:[#allocation4 + $0x70] ss:$8 sps:$4 sm:$0xff]   ;;  %v2543_v23 = vld [vmem:[#allocation4 + $0x84] ss:$8 sps:$4 sm:$0xff]  }
  0x51   :  { %262 = vmatprep.mubr.f32.mxu1 %v2973_v0  ;;  %v2545_v24 = vld [vmem:[#allocation4 + $0x80] ss:$8 sps:$4 sm:$0xff]   ;;  %v2546_v25 = vld [vmem:[#allocation4 + $0x94] ss:$8 sps:$4 sm:$0xff]   ;;  %v2548_v26 = vld [vmem:[#allocation4 + $0x90] ss:$8 sps:$4 sm:$0xff]  }
  0x52   :  { %v2549_v27 = vld [vmem:[#allocation4 + $0xa4] ss:$8 sps:$4 sm:$0xff]   ;;  %v2551_v28 = vld [vmem:[#allocation4 + $0xa0] ss:$8 sps:$4 sm:$0xff]   ;;  %v2552_v29 = vld [vmem:[#allocation4 + $0xb4] ss:$8 sps:$4 sm:$0xff]  }
  0x53   :  { %678 = vmatpush1.bf16.msra.mxu0 %v2524_v10  ;;  %v2554_v30 = vld [vmem:[#allocation4 + $0xb0] ss:$8 sps:$4 sm:$0xff]   ;;  %v2555_v31 = vld [vmem:[#allocation4 + $0xc4] ss:$8 sps:$4 sm:$0xff]   ;;  %v2557_v32 = vld [vmem:[#allocation4 + $0xc0] ss:$8 sps:$4 sm:$0xff]  }
  0x54   :  { %2223 = vmatmul.mubr.msk.f32.vlgmr.msra.gmra.mrb[4].mxu1 %vm114_vm0, %v86_v3  ;;  %679 = vmatprep.subr.bf16.mxu0 %v2525_v11  ;;  %v2558_v33 = vld [vmem:[#allocation4 + $0xd4] ss:$8 sps:$4 sm:$0xff]   ;;  %v2560_v34 = vld [vmem:[#allocation4 + $0xd0] ss:$8 sps:$4 sm:$0xff]   ;;  %v2561_v35 = vld [vmem:[#allocation4 + $0xe4] ss:$8 sps:$4 sm:$0xff]  }
  0x55   :  { %268 = vmatprep.mubr.f32.mxu1 %v2973_v0  ;;  %v2563_v36 = vld [vmem:[#allocation4 + $0xe0] ss:$8 sps:$4 sm:$0xff]   ;;  %v2564_v37 = vld [vmem:[#allocation4 + $0xf4] ss:$8 sps:$4 sm:$0xff]   ;;  %v2566_v38 = vld [vmem:[#allocation4 + $0xf0] ss:$8 sps:$4 sm:$0xff]  }
  0x56   :  { %v2569_v39 = vld [vmem:[#allocation4 + $0x104] ss:$8 sps:$4 sm:$0xff]   ;;  %v2615_v40 = vld [vmem:[#allocation6] ss:$8 sps:$4 sm:$0xff]   ;;  %v2620_v42 = vld [vmem:[#allocation6 + $0x14] ss:$8 sps:$4 sm:$0xff]  }
  0x57   :  { %680 = vmatpush1.bf16.msra.mxu0 %v2527_v12  ;;  %v2617_v41 = vld [vmem:[#allocation6 + $0x4] ss:$8 sps:$4 sm:$0xff]   ;;  %v2618_v43 = vld [vmem:[#allocation6 + $0x10] ss:$8 sps:$4 sm:$0xff]   ;;  %v2621_v45 = vld [vmem:[#allocation6 + $0x20] ss:$8 sps:$4 sm:$0xff]  }
  0x58   :  { %2224 = vmatmul.mubr.msk.f32.gmra.mrb[6].mxu1 %vm114_vm0, %v87_v8  ;;  %681 = vmatprep.subr.bf16.mxu0 %v2528_v13  ;;  %v2623_v44 = vld [vmem:[#allocation6 + $0x24] ss:$8 sps:$4 sm:$0xff]   ;;  %v2626_v46 = vld [vmem:[#allocation6 + $0x34] ss:$8 sps:$4 sm:$0xff]   ;;  %v2624_v47 = vld [vmem:[#allocation6 + $0x30] ss:$8 sps:$4 sm:$0xff]  }
  0x59   :  { %969 = vmatprep.subr.bf16.mxu1 %v2617_v41  ;;  %v2629_v48 = vld [vmem:[#allocation6 + $0x44] ss:$8 sps:$4 sm:$0xff]   ;;  %v2627_v49 = vld [vmem:[#allocation6 + $0x40] ss:$8 sps:$4 sm:$0xff]   ;;  %v2632_v50 = vld [vmem:[#allocation6 + $0x54] ss:$8 sps:$4 sm:$0xff]  }
  0x5a   :  { %970 = vmatpush1.bf16.msra.mxu1 %v2615_v40  ;;  %v2630_v51 = vld [vmem:[#allocation6 + $0x50] ss:$8 sps:$4 sm:$0xff]   ;;  %v2635_v52 = vld [vmem:[#allocation6 + $0x64] ss:$8 sps:$4 sm:$0xff]   ;;  %v2633_v53 = vld [vmem:[#allocation6 + $0x60] ss:$8 sps:$4 sm:$0xff]  }
  0x5b   :  { %682 = vmatpush1.bf16.msra.mxu0 %v2530_v14  ;;  %971 = vmatprep.subr.bf16.mxu1 %v2620_v42  ;;  %v2638_v54 = vld [vmem:[#allocation6 + $0x74] ss:$8 sps:$4 sm:$0xff]   ;;  %v2636_v55 = vld [vmem:[#allocation6 + $0x70] ss:$8 sps:$4 sm:$0xff]   ;;  %v2641_v56 = vld [vmem:[#allocation6 + $0x84] ss:$8 sps:$4 sm:$0xff]  }
  0x5c   :  { %683 = vmatprep.subr.bf16.mxu0 %v2531_v15  ;;  %v2639_v57 = vld [vmem:[#allocation6 + $0x80] ss:$8 sps:$4 sm:$0xff]   ;;  %v2644_v58 = vld [vmem:[#allocation6 + $0x94] ss:$8 sps:$4 sm:$0xff]   ;;  %v2642_v59 = vld [vmem:[#allocation6 + $0x90] ss:$8 sps:$4 sm:$0xff]  }
  0x5d   :  { %v2647_v60 = vld [vmem:[#allocation6 + $0xa4] ss:$8 sps:$4 sm:$0xff]   ;;  %v2645_v61 = vld [vmem:[#allocation6 + $0xa0] ss:$8 sps:$4 sm:$0xff]   ;;  %v2650_v62 = vld [vmem:[#allocation6 + $0xb4] ss:$8 sps:$4 sm:$0xff]  }
  0x5e   :  { %972 = vmatpush1.bf16.msra.mxu1 %v2618_v43  ;;  %v2648_v0 = vld [vmem:[#allocation6 + $0xb0] ss:$8 sps:$4 sm:$0xff]   ;;  %v2653_v1 = vld [vmem:[#allocation6 + $0xc4] ss:$8 sps:$4 sm:$0xff]   ;;  %v2651_v3 = vld [vmem:[#allocation6 + $0xc0] ss:$8 sps:$4 sm:$0xff]  }
  0x5f   :  { %684 = vmatpush1.bf16.msra.mxu0 %v2533_v16  ;;  %973 = vmatprep.subr.bf16.mxu1 %v2623_v44  ;;  %v2656_v4 = vld [vmem:[#allocation6 + $0xd4] ss:$8 sps:$4 sm:$0xff]   ;;  %v3089_v5 = vsub.s32 0, %v95_v2  ;;  %v92_v6 = vld [vmem:[%s3151_s2] sm:$0xf]  ;;  %v3094_v7 = vsub.s32 1, %v95_v2 }
  0x60   :  { %685 = vmatprep.subr.bf16.mxu0 %v2534_v17  ;;  %v2654_v8 = vld [vmem:[#allocation6 + $0xd0] ss:$8 sps:$4 sm:$0xff]   ;;  %v104_v13 = vsub.s32 2, %v95_v2  ;;  %v108_v15 = vsub.s32 3, %v95_v2  ;;  %v2578_v40 = vld [vmem:[#allocation4 + $0x134] ss:$8 sps:$4 sm:$0xff]  }
  0x61   :  { %v97_v10 = vrot.slane %v92_v6, %v3089_v5  ;;  %v101_v12 = vrot.slane %v92_v6, %v3094_v7  ;;  %v2576_v41 = vld [vmem:[#allocation4 + $0x130] ss:$8 sps:$4 sm:$0xff]   ;;  %v2581_v42 = vld [vmem:[#allocation4 + $0x144] ss:$8 sps:$4 sm:$0xff]   ;;  %v2579_v43 = vld [vmem:[#allocation4 + $0x140] ss:$8 sps:$4 sm:$0xff]  }
  0x62   :  { %974 = vmatpush1.bf16.msra.mxu1 %v2621_v45  ;;  %v2584_v44 = vld [vmem:[#allocation4 + $0x154] ss:$8 sps:$4 sm:$0xff]   ;;  %v2582_v45 = vld [vmem:[#allocation4 + $0x150] ss:$8 sps:$4 sm:$0xff]   ;;  %v2609_v63 = vld [vmem:[#allocation4 + $0x1e0] ss:$8 sps:$4 sm:$0xff]  }
  0x63   :  { %686 = vmatpush1.bf16.msra.mxu0 %v2536_v18  ;;  %975 = vmatprep.subr.bf16.mxu1 %v2626_v46  ;;  %v2587_v46 = vld [vmem:[#allocation4 + $0x164] ss:$8 sps:$4 sm:$0xff]  }
  0x64   :  { %687 = vmatprep.subr.bf16.mxu0 %v2537_v19  ;;  %v2659_v2 = vld [vmem:[#allocation6 + $0xe4] ss:$8 sps:$4 sm:$0xff]  }
  0x66   :  { %976 = vmatpush1.bf16.msra.mxu1 %v2624_v47  ;;  %v2585_v47 = vld [vmem:[#allocation4 + $0x160] ss:$8 sps:$4 sm:$0xff]  }
  0x67   :  { %688 = vmatpush1.bf16.msra.mxu0 %v2539_v20  ;;  %977 = vmatprep.subr.bf16.mxu1 %v2629_v48  ;;  %v2590_v48 = vld [vmem:[#allocation4 + $0x174] ss:$8 sps:$4 sm:$0xff]  }
  0x68   :  { %689 = vmatprep.subr.bf16.mxu0 %v2540_v21 }
  0x6a   :  { %978 = vmatpush1.bf16.msra.mxu1 %v2627_v49  ;;  %v2588_v49 = vld [vmem:[#allocation4 + $0x170] ss:$8 sps:$4 sm:$0xff]  }
  0x6b   :  { %690 = vmatpush1.bf16.msra.mxu0 %v2542_v22  ;;  %979 = vmatprep.subr.bf16.mxu1 %v2632_v50  ;;  %v105_v22 = vrot.slane %v92_v6, %v104_v13  ;;  %v2593_v50 = vld [vmem:[#allocation4 + $0x184] ss:$8 sps:$4 sm:$0xff]  }
  0x6c   :  { %691 = vmatprep.subr.bf16.mxu0 %v2543_v23 }
  0x6e   :  { %980 = vmatpush1.bf16.msra.mxu1 %v2630_v51  ;;  %v2591_v51 = vld [vmem:[#allocation4 + $0x180] ss:$8 sps:$4 sm:$0xff]  }
  0x6f   :  { %692 = vmatpush1.bf16.msra.mxu0 %v2545_v24  ;;  %981 = vmatprep.subr.bf16.mxu1 %v2635_v52  ;;  %v2567_v24 = vld [vmem:[#allocation4 + $0x100] ss:$8 sps:$4 sm:$0xff]   ;;  %v2596_v52 = vld [vmem:[#allocation4 + $0x194] ss:$8 sps:$4 sm:$0xff]  }
  0x70   :  { %693 = vmatprep.subr.bf16.mxu0 %v2546_v25 }
  0x72   :  { %982 = vmatpush1.bf16.msra.mxu1 %v2633_v53  ;;  %v2594_v53 = vld [vmem:[#allocation4 + $0x190] ss:$8 sps:$4 sm:$0xff]  }
  0x73   :  { %694 = vmatpush1.bf16.msra.mxu0 %v2548_v26  ;;  %983 = vmatprep.subr.bf16.mxu1 %v2638_v54  ;;  %v109_v26 = vrot.slane %v92_v6, %v108_v15  ;;  %v2599_v54 = vld [vmem:[#allocation4 + $0x1a4] ss:$8 sps:$4 sm:$0xff]   ;;  %v2660_v6 = vld [vmem:[#allocation6 + $0xf0] ss:$8 sps:$4 sm:$0xff]  }
  0x74   :  { %695 = vmatprep.subr.bf16.mxu0 %v2549_v27  ;;  %v2572_v27 = vld [vmem:[#allocation4 + $0x114] ss:$8 sps:$4 sm:$0xff]  }
  0x76   :  { %984 = vmatpush1.bf16.msra.mxu1 %v2636_v55  ;;  %v2597_v55 = vld [vmem:[#allocation4 + $0x1a0] ss:$8 sps:$4 sm:$0xff]  }
  0x77   :  { %696 = vmatpush1.bf16.msra.mxu0 %v2551_v28  ;;  %985 = vmatprep.subr.bf16.mxu1 %v2641_v56  ;;  %v2602_v56 = vld [vmem:[#allocation4 + $0x1b4] ss:$8 sps:$4 sm:$0xff]  }
  0x78   :  { %697 = vmatprep.subr.bf16.mxu0 %v2552_v29 }
  0x7a   :  { %986 = vmatpush1.bf16.msra.mxu1 %v2639_v57  ;;  %v2600_v57 = vld [vmem:[#allocation4 + $0x1b0] ss:$8 sps:$4 sm:$0xff]  }
  0x7b   :  { %698 = vmatpush1.bf16.msra.mxu0 %v2554_v30  ;;  %987 = vmatprep.subr.bf16.mxu1 %v2644_v58  ;;  %v2570_v30 = vld [vmem:[#allocation4 + $0x110] ss:$8 sps:$4 sm:$0xff]   ;;  %v2605_v58 = vld [vmem:[#allocation4 + $0x1c4] ss:$8 sps:$4 sm:$0xff]  }
  0x7c   :  { %699 = vmatprep.subr.bf16.mxu0 %v2555_v31 }
  0x7e   :  { %988 = vmatpush1.bf16.msra.mxu1 %v2642_v59  ;;  %v2603_v59 = vld [vmem:[#allocation4 + $0x1c0] ss:$8 sps:$4 sm:$0xff]  }
  0x7f   :  { %700 = vmatpush1.bf16.msra.mxu0 %v2557_v32  ;;  %989 = vmatprep.subr.bf16.mxu1 %v2647_v60  ;;  %v2608_v60 = vld [vmem:[#allocation4 + $0x1d4] ss:$8 sps:$4 sm:$0xff]  }
  0x80   :  { %701 = vmatprep.subr.bf16.mxu0 %v2558_v33  ;;  %v2575_v33 = vld [vmem:[#allocation4 + $0x124] ss:$8 sps:$4 sm:$0xff]  }
  0x82   :  { %990 = vmatpush1.bf16.msra.mxu1 %v2645_v61  ;;  %v2606_v61 = vld [vmem:[#allocation4 + $0x1d0] ss:$8 sps:$4 sm:$0xff]  }
  0x83   :  { %702 = vmatpush1.bf16.msra.mxu0 %v2560_v34  ;;  %991 = vmatprep.subr.bf16.mxu1 %v2650_v62  ;;  %v2611_v62 = vld [vmem:[#allocation4 + $0x1e4] ss:$8 sps:$4 sm:$0xff]  }
  0x84   :  { %703 = vmatprep.subr.bf16.mxu0 %v2561_v35 }
  0x86   :  { %992 = vmatpush1.bf16.msra.mxu1 %v2648_v0  ;;  %v2614_v0 = vld [vmem:[#allocation4 + $0x1f4] ss:$8 sps:$4 sm:$0xff]  }
  0x87   :  { %704 = vmatpush1.bf16.msra.mxu0 %v2563_v36  ;;  %993 = vmatprep.subr.bf16.mxu1 %v2653_v1  ;;  %v2612_v1 = vld [vmem:[#allocation4 + $0x1f0] ss:$8 sps:$4 sm:$0xff]  }
  0x88   :  { %705 = vmatprep.subr.bf16.mxu0 %v2564_v37 }
  0x8a   :  { %994 = vmatpush1.bf16.msra.mxu1 %v2651_v3  ;;  %v2657_v3 = vld [vmem:[#allocation6 + $0xe0] ss:$8 sps:$4 sm:$0xff]  }
  0x8b   :  { %706 = vmatpush1.bf16.msra.mxu0 %v2566_v38  ;;  %995 = vmatprep.subr.bf16.mxu1 %v2656_v4  ;;  %v2573_v38 = vld [vmem:[#allocation4 + $0x120] ss:$8 sps:$4 sm:$0xff]   ;;  %v2662_v4 = vld [vmem:[#allocation6 + $0xf4] ss:$8 sps:$4 sm:$0xff]  }
  0x8c   :  { %718 = vmatprep.subr.bf16.mxu0 %v2569_v39 }
  0x8e   :  { %996 = vmatpush1.bf16.msra.mxu1 %v2654_v8  ;;  %v2665_v8 = vld [vmem:[#allocation6 + $0x104] ss:$8 sps:$4 sm:$0xff]  }
  0x8f   :  { %997 = vmatprep.subr.bf16.mxu1 %v2659_v2  ;;  %v2728_v2 = vld [vmem:[#allocation6 + $0x254] ss:$8 sps:$4 sm:$0xff]  }
  0x92   :  { %998 = vmatpush1.bf16.msra.mxu1 %v2657_v3  ;;  %v2726_v3 = vld [vmem:[#allocation6 + $0x250] ss:$8 sps:$4 sm:$0xff]  }
  0x93   :  { %999 = vmatprep.subr.bf16.mxu1 %v2662_v4  ;;  %v2731_v4 = vld [vmem:[#allocation6 + $0x264] ss:$8 sps:$4 sm:$0xff]  }
  0x96   :  { %1000 = vmatpush1.bf16.msra.mxu1 %v2660_v6  ;;  %v2729_v6 = vld [vmem:[#allocation6 + $0x260] ss:$8 sps:$4 sm:$0xff]  }
  0x97   :  { %1222 = vmatprep.subr.bf16.mxu1 %v2665_v8  ;;  %v2734_v8 = vld [vmem:[#allocation6 + $0x274] ss:$8 sps:$4 sm:$0xff]  }
 0x11f   :  { %v187_v9 = vpop.f32.mrb[0].mxu1 }
 0x120   :  { %v189_v11 = vpop.f32.mrb[1].mxu1  ;;  %v188_v16 = vadd.f32 %v187_v9, %v97_v10  ;;  %v343_v9 = vld [vmem:[%s3153_s4] sm:$0x3] }
 0x121   :  { %v190_v19 = vadd.f32 %v189_v11, %v101_v12 }
 0x123   :  { %v193_v14 = vpop.f32.mrb[2].mxu1 }
 0x124   :  { %v194_v17 = vadd.f32 %v193_v14, %v97_v10  ;;  %v195_v18 = vpop.f32.mrb[3].mxu1  ;;  %v348_v10 = vrot.slane %v343_v9, %v3089_v5 }
 0x125   :  { %v196_v20 = vadd.f32 %v195_v18, %v101_v12  ;;  %v352_v12 = vrot.slane %v343_v9, %v3094_v7  ;;  %v2732_v9 = vld [vmem:[#allocation6 + $0x270] ss:$8 sps:$4 sm:$0xff]  }
 0x126   :  { %v275_v21 = vpack.c.bf16 %v194_v17, %v188_v16 }
 0x127   :  { %v276_v23 = vpack.c.bf16 %v196_v20, %v190_v19  ;;  %v264_v25 = vpop.f32.mrb[4].mxu1 }
 0x128   :  { %v266_v28 = vpop.f32.mrb[5].mxu1  ;;  %v3098_v29 = vadd.f32 %v264_v25, %v105_v22 }
 0x129   :  { %707 = vmatprep.mubr.bf16.mxu0 %v276_v23  ;;  %v267_v31 = vadd.f32 %v266_v28, %v109_v26  ;;  %v2671_v28 = vld [vmem:[#allocation6 + $0x124] ss:$8 sps:$4 sm:$0xff]  }
 0x12a   :  { %708 = vmatmul.mubr.bf16.vlgmr.msra.gmra.mrb[0].mxu0 %v275_v21 }
 0x12b   :  { %719 = vmatpush1.bf16.msra.mxu0 %v2567_v24  ;;  %v270_v32 = vpop.f32.mrb[6].mxu1  ;;  %v2663_v24 = vld [vmem:[#allocation6 + $0x100] ss:$8 sps:$4 sm:$0xff]  }
 0x12c   :  { %720 = vmatprep.subr.bf16.mxu0 %v2572_v27  ;;  %v271_v34 = vadd.f32 %v270_v32, %v105_v22  ;;  %v272_v35 = vpop.f32.mrb[7].mxu1  ;;  %v2974_v22 = vmov 0   ;;  %v2666_v27 = vld [vmem:[#allocation6 + $0x110] ss:$8 sps:$4 sm:$0xff]   ;;  %v2677_v32 = vld [vmem:[#allocation6 + $0x144] ss:$8 sps:$4 sm:$0xff]  }
 0x12d   :  { %v273_v36 = vadd.f32 %v272_v35, %v109_v26  ;;  %v2668_v26 = vld [vmem:[#allocation6 + $0x114] ss:$8 sps:$4 sm:$0xff]   ;;  %v2678_v35 = vld [vmem:[#allocation6 + $0x150] ss:$8 sps:$4 sm:$0xff]  }
 0x12e   :  { %v277_v37 = vpack.c.bf16 %v271_v34, %v3098_v29  ;;  %v2669_v29 = vld [vmem:[#allocation6 + $0x120] ss:$8 sps:$4 sm:$0xff]   ;;  %v2680_v34 = vld [vmem:[#allocation6 + $0x154] ss:$8 sps:$4 sm:$0xff]  }
 0x12f   :  { %721 = vmatpush1.bf16.msra.mxu0 %v2570_v30  ;;  %v278_v39 = vpack.c.bf16 %v273_v36, %v267_v31  ;;  %v2674_v30 = vld [vmem:[#allocation6 + $0x134] ss:$8 sps:$4 sm:$0xff]   ;;  %v2672_v31 = vld [vmem:[#allocation6 + $0x130] ss:$8 sps:$4 sm:$0xff]   ;;  %v2683_v36 = vld [vmem:[#allocation6 + $0x164] ss:$8 sps:$4 sm:$0xff]  }
 0x130   :  { %722 = vmatprep.subr.bf16.mxu0 %v2575_v33  ;;  %v2675_v33 = vld [vmem:[#allocation6 + $0x140] ss:$8 sps:$4 sm:$0xff]  }
 0x131   :  { %750 = vmatprep.mubr.bf16.mxu0 %v278_v39  ;;  %v2684_v39 = vld [vmem:[#allocation6 + $0x170] ss:$8 sps:$4 sm:$0xff]  }
 0x133   :  { %723 = vmatpush1.bf16.msra.mxu0 %v2573_v38  ;;  %v2686_v38 = vld [vmem:[#allocation6 + $0x174] ss:$8 sps:$4 sm:$0xff]  }
 0x134   :  { %724 = vmatprep.subr.bf16.mxu0 %v2578_v40  ;;  %v2689_v40 = vld [vmem:[#allocation6 + $0x184] ss:$8 sps:$4 sm:$0xff]  }
 0x137   :  { %725 = vmatpush1.bf16.msra.mxu0 %v2576_v41  ;;  %v2687_v41 = vld [vmem:[#allocation6 + $0x180] ss:$8 sps:$4 sm:$0xff]  }
 0x138   :  { %726 = vmatprep.subr.bf16.mxu0 %v2581_v42  ;;  %v2692_v42 = vld [vmem:[#allocation6 + $0x194] ss:$8 sps:$4 sm:$0xff]  }
 0x13b   :  { %727 = vmatpush1.bf16.msra.mxu0 %v2579_v43  ;;  %v2690_v43 = vld [vmem:[#allocation6 + $0x190] ss:$8 sps:$4 sm:$0xff]  }
 0x13c   :  { %728 = vmatprep.subr.bf16.mxu0 %v2584_v44  ;;  %v2695_v44 = vld [vmem:[#allocation6 + $0x1a4] ss:$8 sps:$4 sm:$0xff]  }
 0x13f   :  { %729 = vmatpush1.bf16.msra.mxu0 %v2582_v45  ;;  %v2693_v45 = vld [vmem:[#allocation6 + $0x1a0] ss:$8 sps:$4 sm:$0xff]  }
 0x140   :  { %730 = vmatprep.subr.bf16.mxu0 %v2587_v46  ;;  %v2698_v46 = vld [vmem:[#allocation6 + $0x1b4] ss:$8 sps:$4 sm:$0xff]  }
 0x143   :  { %731 = vmatpush1.bf16.msra.mxu0 %v2585_v47  ;;  %v2696_v47 = vld [vmem:[#allocation6 + $0x1b0] ss:$8 sps:$4 sm:$0xff]  }
 0x144   :  { %732 = vmatprep.subr.bf16.mxu0 %v2590_v48  ;;  %v2701_v48 = vld [vmem:[#allocation6 + $0x1c4] ss:$8 sps:$4 sm:$0xff]  }
 0x147   :  { %733 = vmatpush1.bf16.msra.mxu0 %v2588_v49  ;;  %v2699_v49 = vld [vmem:[#allocation6 + $0x1c0] ss:$8 sps:$4 sm:$0xff]  }
 0x148   :  { %734 = vmatprep.subr.bf16.mxu0 %v2593_v50  ;;  %v2704_v50 = vld [vmem:[#allocation6 + $0x1d4] ss:$8 sps:$4 sm:$0xff]  }
 0x14b   :  { %735 = vmatpush1.bf16.msra.mxu0 %v2591_v51  ;;  %v2702_v51 = vld [vmem:[#allocation6 + $0x1d0] ss:$8 sps:$4 sm:$0xff]  }
 0x14c   :  { %736 = vmatprep.subr.bf16.mxu0 %v2596_v52  ;;  %v2707_v52 = vld [vmem:[#allocation6 + $0x1e4] ss:$8 sps:$4 sm:$0xff]  }
 0x14f   :  { %737 = vmatpush1.bf16.msra.mxu0 %v2594_v53  ;;  %v2705_v53 = vld [vmem:[#allocation6 + $0x1e0] ss:$8 sps:$4 sm:$0xff]  }
 0x150   :  { %738 = vmatprep.subr.bf16.mxu0 %v2599_v54  ;;  %v2710_v54 = vld [vmem:[#allocation6 + $0x1f4] ss:$8 sps:$4 sm:$0xff]  }
 0x153   :  { %739 = vmatpush1.bf16.msra.mxu0 %v2597_v55  ;;  %v2708_v55 = vld [vmem:[#allocation6 + $0x1f0] ss:$8 sps:$4 sm:$0xff]  }
 0x154   :  { %740 = vmatprep.subr.bf16.mxu0 %v2602_v56  ;;  %v2711_v56 = vld [vmem:[#allocation6 + $0x200] ss:$8 sps:$4 sm:$0xff]  }
 0x157   :  { %741 = vmatpush1.bf16.msra.mxu0 %v2600_v57  ;;  %v2713_v57 = vld [vmem:[#allocation6 + $0x204] ss:$8 sps:$4 sm:$0xff]  }
 0x158   :  { %742 = vmatprep.subr.bf16.mxu0 %v2605_v58  ;;  %v2716_v58 = vld [vmem:[#allocation6 + $0x214] ss:$8 sps:$4 sm:$0xff]  }
 0x15b   :  { %743 = vmatpush1.bf16.msra.mxu0 %v2603_v59  ;;  %v2714_v59 = vld [vmem:[#allocation6 + $0x210] ss:$8 sps:$4 sm:$0xff]  }
 0x15c   :  { %744 = vmatprep.subr.bf16.mxu0 %v2608_v60  ;;  %v2719_v60 = vld [vmem:[#allocation6 + $0x224] ss:$8 sps:$4 sm:$0xff]  }
 0x15f   :  { %745 = vmatpush1.bf16.msra.mxu0 %v2606_v61  ;;  %v2717_v61 = vld [vmem:[#allocation6 + $0x220] ss:$8 sps:$4 sm:$0xff]  }
 0x160   :  { %746 = vmatprep.subr.bf16.mxu0 %v2611_v62  ;;  %v2722_v62 = vld [vmem:[#allocation6 + $0x234] ss:$8 sps:$4 sm:$0xff]  }
 0x163   :  { %747 = vmatpush1.bf16.msra.mxu0 %v2609_v63  ;;  %v2720_v63 = vld [vmem:[#allocation6 + $0x230] ss:$8 sps:$4 sm:$0xff]  }
 0x164   :  { %748 = vmatprep.subr.bf16.mxu0 %v2614_v0  ;;  %v2725_v0 = vld [vmem:[#allocation6 + $0x244] ss:$8 sps:$4 sm:$0xff]  }
 0x167   :  { %749 = vmatpush1.bf16.msra.mxu0 %v2612_v1  ;;  %v2723_v1 = vld [vmem:[#allocation6 + $0x240] ss:$8 sps:$4 sm:$0xff]  }
 0x168   :  { %1475 = vmatprep.subr.bf16.mxu0 %v2713_v57  ;;  %v2780_v57 = vld [vmem:[#allocation6 + $0x370] ss:$8 sps:$4 sm:$0xff]  }
 0x16a   :  { %751 = vmatmul.mubr.bf16.vlgmr.msra.gmra.mrb[0].mxu0 %v277_v37  ;;  %v2681_v37 = vld [vmem:[#allocation6 + $0x160] ss:$8 sps:$4 sm:$0xff]  }
 0x16b   :  { %1476 = vmatpush1.bf16.msra.mxu0 %v2711_v56  ;;  %v2782_v56 = vld [vmem:[#allocation6 + $0x374] ss:$8 sps:$4 sm:$0xff]  }
 0x16c   :  { %1477 = vmatprep.subr.bf16.mxu0 %v2716_v58  ;;  %v2785_v58 = vld [vmem:[#allocation6 + $0x384] ss:$8 sps:$4 sm:$0xff]  }
 0x16f   :  { %1478 = vmatpush1.bf16.msra.mxu0 %v2714_v59  ;;  %v2783_v59 = vld [vmem:[#allocation6 + $0x380] ss:$8 sps:$4 sm:$0xff]  }
 0x170   :  { %1479 = vmatprep.subr.bf16.mxu0 %v2719_v60  ;;  %v2788_v60 = vld [vmem:[#allocation6 + $0x394] ss:$8 sps:$4 sm:$0xff]  }
 0x173   :  { %1480 = vmatpush1.bf16.msra.mxu0 %v2717_v61  ;;  %v2786_v61 = vld [vmem:[#allocation6 + $0x390] ss:$8 sps:$4 sm:$0xff]  }
 0x174   :  { %1481 = vmatprep.subr.bf16.mxu0 %v2722_v62  ;;  %v2791_v62 = vld [vmem:[#allocation6 + $0x3a4] ss:$8 sps:$4 sm:$0xff]  }
 0x177   :  { %1482 = vmatpush1.bf16.msra.mxu0 %v2720_v63  ;;  %v2789_v63 = vld [vmem:[#allocation6 + $0x3a0] ss:$8 sps:$4 sm:$0xff]  }
 0x178   :  { %1483 = vmatprep.subr.bf16.mxu0 %v2725_v0  ;;  %v2794_v0 = vld [vmem:[#allocation6 + $0x3b4] ss:$8 sps:$4 sm:$0xff]  }
 0x17b   :  { %1484 = vmatpush1.bf16.msra.mxu0 %v2723_v1  ;;  %v2792_v1 = vld [vmem:[#allocation6 + $0x3b0] ss:$8 sps:$4 sm:$0xff]  }
 0x17c   :  { %1485 = vmatprep.subr.bf16.mxu0 %v2728_v2  ;;  %v2797_v2 = vld [vmem:[#allocation6 + $0x3c4] ss:$8 sps:$4 sm:$0xff]  }
 0x17f   :  { %1486 = vmatpush1.bf16.msra.mxu0 %v2726_v3  ;;  %v2795_v3 = vld [vmem:[#allocation6 + $0x3c0] ss:$8 sps:$4 sm:$0xff]  }
 0x180   :  { %1487 = vmatprep.subr.bf16.mxu0 %v2731_v4  ;;  %v2800_v4 = vld [vmem:[#allocation6 + $0x3d4] ss:$8 sps:$4 sm:$0xff]  }
 0x183   :  { %1488 = vmatpush1.bf16.msra.mxu0 %v2729_v6  ;;  %v2798_v6 = vld [vmem:[#allocation6 + $0x3d0] ss:$8 sps:$4 sm:$0xff]  }
 0x184   :  { %1489 = vmatprep.subr.bf16.mxu0 %v2734_v8  ;;  %v2321_v8 = vld [vmem:[%s3155_s6 + $0x2] sm:$0x3] }
 0x187   :  { %1490 = vmatpush1.bf16.msra.mxu0 %v2732_v9  ;;  %v1055_v9 = vrot.slane %v2321_v8, %v3089_v5 }
 0x23d   :  { %v752_v11 = vpop.f32.mrb[0].mxu0 }
 0x23e   :  { %v754_v13 = vpop.f32.mrb[1].mxu0  ;;  %v2501_v15 = vadd.f32 %v752_v11, %v348_v10  ;;  %v2735_v11 = vld [vmem:[#allocation6 + $0x280] ss:$8 sps:$4 sm:$0xff]  }
 0x23f   :  { %v756_v14 = vpop.f32.mrb[2].mxu0  ;;  %v2502_v18 = vadd.f32 %v754_v13, %v352_v12  ;;  %v2738_v13 = vld [vmem:[#allocation6 + $0x290] ss:$8 sps:$4 sm:$0xff]  }
 0x240   :  { %v2503_v16 = vadd.f32 %v756_v14, %v348_v10  ;;  %v758_v17 = vpop.f32.mrb[3].mxu0  ;;  %v2737_v10 = vld [vmem:[#allocation6 + $0x284] ss:$8 sps:$4 sm:$0xff]  }
 0x241   :  { %v2504_v19 = vadd.f32 %v758_v17, %v352_v12  ;;  %1491 = vmatprep.subr.bf16.mxu0 %v2737_v10  ;;  %v2740_v12 = vld [vmem:[#allocation6 + $0x294] ss:$8 sps:$4 sm:$0xff]   ;;  %v2743_v14 = vld [vmem:[#allocation6 + $0x2a4] ss:$8 sps:$4 sm:$0xff]   ;;  %v2744_v17 = vld [vmem:[#allocation6 + $0x2b0] ss:$8 sps:$4 sm:$0xff]  }
 0x242   :  { %v761_v20 = vpack.c.bf16 %v2503_v16, %v2501_v15  ;;  %1492 = vmatpush1.bf16.msra.mxu0 %v2735_v11  ;;  %v2741_v15 = vld [vmem:[#allocation6 + $0x2a0] ss:$8 sps:$4 sm:$0xff]   ;;  %v2746_v16 = vld [vmem:[#allocation6 + $0x2b4] ss:$8 sps:$4 sm:$0xff]   ;;  %v1059_v11 = vrot.slane %v2321_v8, %v3094_v7 }
 0x243   :  { %v762_v21 = vpack.c.bf16 %v2504_v19, %v2502_v18  ;;  %1493 = vmatprep.subr.bf16.mxu0 %v2740_v12  ;;  %v2749_v18 = vld [vmem:[#allocation6 + $0x2c4] ss:$8 sps:$4 sm:$0xff]   ;;  %v2747_v19 = vld [vmem:[#allocation6 + $0x2c0] ss:$8 sps:$4 sm:$0xff]  }
 0x244   :  { %v763_v25 = vmax.bf16 %v2974_v22, %v761_v20  ;;  %v2752_v20 = vld [vmem:[#allocation6 + $0x2d4] ss:$8 sps:$4 sm:$0xff]  }
 0x245   :  { %v764_v23 = vmax.bf16 %v2974_v22, %v762_v21  ;;  %v2750_v21 = vld [vmem:[#allocation6 + $0x2d0] ss:$8 sps:$4 sm:$0xff]  }
 0x246   :  { %1494 = vmatpush1.bf16.msra.mxu0 %v2738_v13 }
 0x247   :  { %1001 = vmatprep.mubr.bf16.mxu1 %v764_v23  ;;  %1495 = vmatprep.subr.bf16.mxu0 %v2743_v14  ;;  %v797_v23 = vld [vmem:[%s3155_s6] sm:$0x3] }
 0x248   :  { %1002 = vmatmul.mubr.bf16.vlgmr.msra.gmra.mrb[8].mxu1 %v763_v25 }
 0x249   :  { %1223 = vmatpush1.bf16.msra.mxu1 %v2663_v24  ;;  %v802_v24 = vrot.slane %v797_v23, %v3089_v5 }
 0x24a   :  { %1224 = vmatprep.subr.bf16.mxu1 %v2668_v26  ;;  %1496 = vmatpush1.bf16.msra.mxu0 %v2741_v15  ;;  %v806_v26 = vrot.slane %v797_v23, %v3094_v7 }
 0x24b   :  { %1497 = vmatprep.subr.bf16.mxu0 %v2746_v16 }
 0x24d   :  { %1225 = vmatpush1.bf16.msra.mxu1 %v2666_v27 }
 0x24e   :  { %1226 = vmatprep.subr.bf16.mxu1 %v2671_v28  ;;  %1498 = vmatpush1.bf16.msra.mxu0 %v2744_v17 }
 0x24f   :  { %1499 = vmatprep.subr.bf16.mxu0 %v2749_v18 }
 0x251   :  { %1227 = vmatpush1.bf16.msra.mxu1 %v2669_v29 }
 0x252   :  { %1228 = vmatprep.subr.bf16.mxu1 %v2674_v30  ;;  %1500 = vmatpush1.bf16.msra.mxu0 %v2747_v19 }
 0x253   :  { %1501 = vmatprep.subr.bf16.mxu0 %v2752_v20 }
 0x255   :  { %1229 = vmatpush1.bf16.msra.mxu1 %v2672_v31 }
 0x256   :  { %1230 = vmatprep.subr.bf16.mxu1 %v2677_v32  ;;  %1502 = vmatpush1.bf16.msra.mxu0 %v2750_v21 }
 0x259   :  { %1231 = vmatpush1.bf16.msra.mxu1 %v2675_v33 }
 0x25a   :  { %1232 = vmatprep.subr.bf16.mxu1 %v2680_v34 }
 0x25d   :  { %1233 = vmatpush1.bf16.msra.mxu1 %v2678_v35 }
 0x25e   :  { %1234 = vmatprep.subr.bf16.mxu1 %v2683_v36 }
 0x261   :  { %1235 = vmatpush1.bf16.msra.mxu1 %v2681_v37 }
 0x262   :  { %1236 = vmatprep.subr.bf16.mxu1 %v2686_v38  ;;  %v2755_v38 = vld [vmem:[#allocation6 + $0x2e4] ss:$8 sps:$4 sm:$0xff]  }
 0x263   :  { %1503 = vmatprep.subr.bf16.mxu0 %v2755_v38  ;;  %v2824_v38 = vld [vmem:[#allocation6 + $0x454] ss:$8 sps:$4 sm:$0xff]  }
 0x265   :  { %1237 = vmatpush1.bf16.msra.mxu1 %v2684_v39  ;;  %v2753_v39 = vld [vmem:[#allocation6 + $0x2e0] ss:$8 sps:$4 sm:$0xff]  }
 0x266   :  { %1238 = vmatprep.subr.bf16.mxu1 %v2689_v40  ;;  %1504 = vmatpush1.bf16.msra.mxu0 %v2753_v39  ;;  %v2758_v40 = vld [vmem:[#allocation6 + $0x2f4] ss:$8 sps:$4 sm:$0xff]   ;;  %v2822_v39 = vld [vmem:[#allocation6 + $0x450] ss:$8 sps:$4 sm:$0xff]  }
 0x267   :  { %1505 = vmatprep.subr.bf16.mxu0 %v2758_v40  ;;  %v2827_v40 = vld [vmem:[#allocation6 + $0x464] ss:$8 sps:$4 sm:$0xff]  }
 0x269   :  { %1239 = vmatpush1.bf16.msra.mxu1 %v2687_v41  ;;  %v2756_v41 = vld [vmem:[#allocation6 + $0x2f0] ss:$8 sps:$4 sm:$0xff]  }
 0x26a   :  { %1240 = vmatprep.subr.bf16.mxu1 %v2692_v42  ;;  %1506 = vmatpush1.bf16.msra.mxu0 %v2756_v41  ;;  %v2759_v42 = vld [vmem:[#allocation6 + $0x300] ss:$8 sps:$4 sm:$0xff]  }
 0x26b   :  { %v2825_v41 = vld [vmem:[#allocation6 + $0x460] ss:$8 sps:$4 sm:$0xff]  }
 0x26d   :  { %1241 = vmatpush1.bf16.msra.mxu1 %v2690_v43  ;;  %v2761_v43 = vld [vmem:[#allocation6 + $0x304] ss:$8 sps:$4 sm:$0xff]  }
 0x26e   :  { %1242 = vmatprep.subr.bf16.mxu1 %v2695_v44  ;;  %v2764_v44 = vld [vmem:[#allocation6 + $0x314] ss:$8 sps:$4 sm:$0xff]  }
 0x271   :  { %1243 = vmatpush1.bf16.msra.mxu1 %v2693_v45  ;;  %v2762_v45 = vld [vmem:[#allocation6 + $0x310] ss:$8 sps:$4 sm:$0xff]  }
 0x272   :  { %1244 = vmatprep.subr.bf16.mxu1 %v2698_v46  ;;  %v2767_v46 = vld [vmem:[#allocation6 + $0x324] ss:$8 sps:$4 sm:$0xff]  }
 0x275   :  { %1245 = vmatpush1.bf16.msra.mxu1 %v2696_v47  ;;  %v2765_v47 = vld [vmem:[#allocation6 + $0x320] ss:$8 sps:$4 sm:$0xff]  }
 0x276   :  { %1246 = vmatprep.subr.bf16.mxu1 %v2701_v48  ;;  %v2770_v48 = vld [vmem:[#allocation6 + $0x334] ss:$8 sps:$4 sm:$0xff]  }
 0x279   :  { %1247 = vmatpush1.bf16.msra.mxu1 %v2699_v49  ;;  %v2768_v49 = vld [vmem:[#allocation6 + $0x330] ss:$8 sps:$4 sm:$0xff]  }
 0x27a   :  { %1248 = vmatprep.subr.bf16.mxu1 %v2704_v50  ;;  %v2773_v50 = vld [vmem:[#allocation6 + $0x344] ss:$8 sps:$4 sm:$0xff]  }
 0x27d   :  { %1249 = vmatpush1.bf16.msra.mxu1 %v2702_v51  ;;  %v2771_v51 = vld [vmem:[#allocation6 + $0x340] ss:$8 sps:$4 sm:$0xff]  }
 0x27e   :  { %1250 = vmatprep.subr.bf16.mxu1 %v2707_v52  ;;  %v2776_v52 = vld [vmem:[#allocation6 + $0x354] ss:$8 sps:$4 sm:$0xff]  }
 0x281   :  { %1251 = vmatpush1.bf16.msra.mxu1 %v2705_v53  ;;  %v2774_v53 = vld [vmem:[#allocation6 + $0x350] ss:$8 sps:$4 sm:$0xff]  }
 0x282   :  { %1252 = vmatprep.subr.bf16.mxu1 %v2710_v54  ;;  %v2779_v54 = vld [vmem:[#allocation6 + $0x364] ss:$8 sps:$4 sm:$0xff]  }
 0x285   :  { %1253 = vmatpush1.bf16.msra.mxu1 %v2708_v55  ;;  %v2777_v55 = vld [vmem:[#allocation6 + $0x360] ss:$8 sps:$4 sm:$0xff]  }
 0x286   :  { %1728 = vmatprep.subr.bf16.mxu1 %v2761_v43  ;;  %v2828_v43 = vld [vmem:[#allocation6 + $0x470] ss:$8 sps:$4 sm:$0xff]  }
 0x31b   :  { %v1003_v25 = vpop.f32.mrb[8].mxu1 }
 0x31c   :  { %v1005_v27 = vpop.f32.mrb[9].mxu1  ;;  %v1004_v29 = vadd.f32 %v1003_v25, %v802_v24  ;;  %v2801_v25 = vld [vmem:[#allocation6 + $0x3e0] ss:$8 sps:$4 sm:$0xff]  }
 0x31d   :  { %v1007_v28 = vpop.f32.mrb[10].mxu1  ;;  %v1006_v32 = vadd.f32 %v1005_v27, %v806_v26  ;;  %v2804_v27 = vld [vmem:[#allocation6 + $0x3f0] ss:$8 sps:$4 sm:$0xff]  }
 0x31e   :  { %v1008_v30 = vadd.f32 %v1007_v28, %v802_v24  ;;  %v1009_v31 = vpop.f32.mrb[11].mxu1  ;;  %v2803_v24 = vld [vmem:[#allocation6 + $0x3e4] ss:$8 sps:$4 sm:$0xff]   ;;  %v2807_v28 = vld [vmem:[#allocation6 + $0x400] ss:$8 sps:$4 sm:$0xff]  }
 0x31f   :  { %v1010_v33 = vadd.f32 %v1009_v31, %v806_v26  ;;  %v2806_v26 = vld [vmem:[#allocation6 + $0x3f4] ss:$8 sps:$4 sm:$0xff]   ;;  %v2810_v31 = vld [vmem:[#allocation6 + $0x410] ss:$8 sps:$4 sm:$0xff]  }
 0x320   :  { %v1012_v34 = vpack.c.bf16 %v1008_v30, %v1004_v29  ;;  %v2809_v29 = vld [vmem:[#allocation6 + $0x404] ss:$8 sps:$4 sm:$0xff]   ;;  %v2812_v30 = vld [vmem:[#allocation6 + $0x414] ss:$8 sps:$4 sm:$0xff]  }
 0x321   :  { %v1013_v35 = vpack.c.bf16 %v1010_v33, %v1006_v32  ;;  %1981 = vmatprep.subr.bf16.mxu0 %v2809_v29  ;;  %v2815_v32 = vld [vmem:[#allocation6 + $0x424] ss:$8 sps:$4 sm:$0xff]   ;;  %v2813_v33 = vld [vmem:[#allocation6 + $0x420] ss:$8 sps:$4 sm:$0xff]  }
 0x322   :  { %v1014_v37 = vmax.bf16 %v2974_v22, %v1012_v34  ;;  %v2818_v34 = vld [vmem:[#allocation6 + $0x434] ss:$8 sps:$4 sm:$0xff]  }
 0x323   :  { %v1015_v36 = vmax.bf16 %v2974_v22, %v1013_v35  ;;  %v2816_v35 = vld [vmem:[#allocation6 + $0x430] ss:$8 sps:$4 sm:$0xff]  }
 0x325   :  { %1254 = vmatprep.mubr.bf16.mxu1 %v1015_v36  ;;  %v2821_v36 = vld [vmem:[#allocation6 + $0x444] ss:$8 sps:$4 sm:$0xff]  }
 0x326   :  { %1255 = vmatmul.mubr.bf16.vlgmr.msra.gmra.mrb[12].mxu1 %v1014_v37  ;;  %v2819_v37 = vld [vmem:[#allocation6 + $0x440] ss:$8 sps:$4 sm:$0xff]  }
 0x327   :  { %1729 = vmatpush1.bf16.msra.mxu1 %v2759_v42  ;;  %v2830_v42 = vld [vmem:[#allocation6 + $0x474] ss:$8 sps:$4 sm:$0xff]  }
 0x328   :  { %1730 = vmatprep.subr.bf16.mxu1 %v2764_v44  ;;  %v2833_v44 = vld [vmem:[#allocation6 + $0x484] ss:$8 sps:$4 sm:$0xff]  }
 0x32b   :  { %1731 = vmatpush1.bf16.msra.mxu1 %v2762_v45  ;;  %v2831_v45 = vld [vmem:[#allocation6 + $0x480] ss:$8 sps:$4 sm:$0xff]  }
 0x32c   :  { %1732 = vmatprep.subr.bf16.mxu1 %v2767_v46  ;;  %v2836_v46 = vld [vmem:[#allocation6 + $0x494] ss:$8 sps:$4 sm:$0xff]  }
 0x32f   :  { %1733 = vmatpush1.bf16.msra.mxu1 %v2765_v47  ;;  %v2834_v47 = vld [vmem:[#allocation6 + $0x490] ss:$8 sps:$4 sm:$0xff]  }
 0x330   :  { %1734 = vmatprep.subr.bf16.mxu1 %v2770_v48  ;;  %v2839_v48 = vld [vmem:[#allocation6 + $0x4a4] ss:$8 sps:$4 sm:$0xff]  }
 0x333   :  { %1735 = vmatpush1.bf16.msra.mxu1 %v2768_v49  ;;  %v2837_v49 = vld [vmem:[#allocation6 + $0x4a0] ss:$8 sps:$4 sm:$0xff]  }
 0x334   :  { %1736 = vmatprep.subr.bf16.mxu1 %v2773_v50  ;;  %v2842_v50 = vld [vmem:[#allocation6 + $0x4b4] ss:$8 sps:$4 sm:$0xff]  }
 0x337   :  { %1737 = vmatpush1.bf16.msra.mxu1 %v2771_v51  ;;  %v2840_v51 = vld [vmem:[#allocation6 + $0x4b0] ss:$8 sps:$4 sm:$0xff]  }
 0x338   :  { %1738 = vmatprep.subr.bf16.mxu1 %v2776_v52  ;;  %v2845_v52 = vld [vmem:[#allocation6 + $0x4c4] ss:$8 sps:$4 sm:$0xff]  }
 0x33b   :  { %1739 = vmatpush1.bf16.msra.mxu1 %v2774_v53  ;;  %v2843_v53 = vld [vmem:[#allocation6 + $0x4c0] ss:$8 sps:$4 sm:$0xff]  }
 0x33c   :  { %1740 = vmatprep.subr.bf16.mxu1 %v2779_v54  ;;  %v2848_v54 = vld [vmem:[#allocation6 + $0x4d4] ss:$8 sps:$4 sm:$0xff]  }
 0x33f   :  { %1741 = vmatpush1.bf16.msra.mxu1 %v2777_v55  ;;  %v2846_v55 = vld [vmem:[#allocation6 + $0x4d0] ss:$8 sps:$4 sm:$0xff]  }
 0x340   :  { %1742 = vmatprep.subr.bf16.mxu1 %v2782_v56  ;;  %v2354_v56 = vld [vmem:[%s3155_s6 + $0x4] sm:$0x3] }
 0x343   :  { %1743 = vmatpush1.bf16.msra.mxu1 %v2780_v57  ;;  %v1308_v57 = vrot.slane %v2354_v56, %v3089_v5 }
 0x344   :  { %1744 = vmatprep.subr.bf16.mxu1 %v2785_v58 }
 0x347   :  { %1745 = vmatpush1.bf16.msra.mxu1 %v2783_v59  ;;  %v1312_v59 = vrot.slane %v2354_v56, %v3094_v7 }
 0x348   :  { %1746 = vmatprep.subr.bf16.mxu1 %v2788_v60 }
 0x34b   :  { %1747 = vmatpush1.bf16.msra.mxu1 %v2786_v61 }
 0x34c   :  { %1748 = vmatprep.subr.bf16.mxu1 %v2791_v62 }
 0x34f   :  { %1749 = vmatpush1.bf16.msra.mxu1 %v2789_v63 }
 0x350   :  { %1750 = vmatprep.subr.bf16.mxu1 %v2794_v0 }
 0x353   :  { %1751 = vmatpush1.bf16.msra.mxu1 %v2792_v1 }
 0x354   :  { %1752 = vmatprep.subr.bf16.mxu1 %v2797_v2 }
 0x357   :  { %1753 = vmatpush1.bf16.msra.mxu1 %v2795_v3 }
 0x358   :  { %1754 = vmatprep.subr.bf16.mxu1 %v2800_v4 }
 0x35b   :  { %1755 = vmatpush1.bf16.msra.mxu1 %v2798_v6 }
 0x35c   :  { %1756 = vmatprep.subr.bf16.mxu1 %v2803_v24  ;;  %v2865_v24 = vld [vmem:[#allocation7 + $0x68] sm:$0xff]  }
 0x35f   :  { %1757 = vmatpush1.bf16.msra.mxu1 %v2801_v25  ;;  %v2387_v25 = vld [vmem:[%s3155_s6 + $0x6] sm:$0x3] }
 0x360   :  { %1758 = vmatprep.subr.bf16.mxu1 %v2806_v26  ;;  %v1561_v26 = vrot.slane %v2387_v25, %v3089_v5 }
 0x363   :  { %1759 = vmatpush1.bf16.msra.mxu1 %v2804_v27 }
 0x3f9   :  { %v1256_v10 = vpop.f32.mrb[12].mxu1 }
 0x3fa   :  { %v1258_v12 = vpop.f32.mrb[13].mxu1  ;;  %v1257_v14 = vadd.f32 %v1256_v10, %v1055_v9  ;;  %v2849_v10 = vld [vmem:[#allocation6 + $0x4e0] ss:$8 sps:$4 sm:$0xff]  }
 0x3fb   :  { %v1260_v13 = vpop.f32.mrb[14].mxu1  ;;  %v1259_v17 = vadd.f32 %v1258_v12, %v1059_v11  ;;  %v2852_v12 = vld [vmem:[#allocation6 + $0x4f0] ss:$8 sps:$4 sm:$0xff]  }
 0x3fc   :  { %v1261_v15 = vadd.f32 %v1260_v13, %v1055_v9  ;;  %v1262_v16 = vpop.f32.mrb[15].mxu1  ;;  %v2851_v9 = vld [vmem:[#allocation6 + $0x4e4] ss:$8 sps:$4 sm:$0xff]  }
 0x3fd   :  { %v1263_v18 = vadd.f32 %v1262_v16, %v1059_v11  ;;  %v2854_v11 = vld [vmem:[#allocation6 + $0x4f4] ss:$8 sps:$4 sm:$0xff]   ;;  %v2855_v13 = vld [vmem:[#allocation7 + $0x40] sm:$0xff]   ;;  %v2858_v16 = vld [vmem:[#allocation7 + $0x8] sm:$0xff]  }
 0x3fe   :  { %v1265_v19 = vpack.c.bf16 %v1261_v15, %v1257_v14  ;;  %v2856_v14 = vld [vmem:[#allocation7] sm:$0xff]   ;;  %v2857_v15 = vld [vmem:[#allocation7 + $0x48] sm:$0xff]   ;;  %2479 = vmatprep.subr.bf16.mxu1 %v2855_v13 }
 0x3ff   :  { %v1266_v20 = vpack.c.bf16 %v1263_v18, %v1259_v17  ;;  %v2859_v17 = vld [vmem:[#allocation7 + $0x50] sm:$0xff]  }
 0x400   :  { %v1267_v23 = vmax.bf16 %v2974_v22, %v1265_v19  ;;  %v2860_v18 = vld [vmem:[#allocation7 + $0x10] sm:$0xff]   ;;  %v2861_v19 = vld [vmem:[#allocation7 + $0x58] sm:$0xff]  }
 0x401   :  { %v1268_v21 = vmax.bf16 %v2974_v22, %v1266_v20  ;;  %v2862_v20 = vld [vmem:[#allocation7 + $0x18] sm:$0xff]  }
 0x403   :  { %1507 = vmatprep.mubr.bf16.mxu0 %v1268_v21  ;;  %v2863_v21 = vld [vmem:[#allocation7 + $0x60] sm:$0xff]  }
 0x404   :  { %1508 = vmatmul.mubr.bf16.vlgmr.msra.gmra.mrb[4].mxu0 %v1267_v23  ;;  %v2864_v23 = vld [vmem:[#allocation7 + $0x20] sm:$0xff]  }
 0x405   :  { %1982 = vmatpush1.bf16.msra.mxu0 %v2807_v28  ;;  %v1565_v28 = vrot.slane %v2387_v25, %v3094_v7 }
 0x406   :  { %1983 = vmatprep.subr.bf16.mxu0 %v2812_v30 }
 0x409   :  { %1984 = vmatpush1.bf16.msra.mxu0 %v2810_v31 }
 0x40a   :  { %1985 = vmatprep.subr.bf16.mxu0 %v2815_v32 }
 0x40d   :  { %1986 = vmatpush1.bf16.msra.mxu0 %v2813_v33 }
 0x40e   :  { %1987 = vmatprep.subr.bf16.mxu0 %v2818_v34 }
 0x411   :  { %1988 = vmatpush1.bf16.msra.mxu0 %v2816_v35 }
 0x412   :  { %1989 = vmatprep.subr.bf16.mxu0 %v2821_v36 }
 0x415   :  { %1990 = vmatpush1.bf16.msra.mxu0 %v2819_v37 }
 0x416   :  { %1991 = vmatprep.subr.bf16.mxu0 %v2824_v38 }
 0x419   :  { %1992 = vmatpush1.bf16.msra.mxu0 %v2822_v39 }
 0x41a   :  { %1993 = vmatprep.subr.bf16.mxu0 %v2827_v40  ;;  %v2866_v40 = vld [vmem:[#allocation7 + $0x28] sm:$0xff]  }
 0x41d   :  { %1994 = vmatpush1.bf16.msra.mxu0 %v2825_v41  ;;  %v2867_v41 = vld [vmem:[#allocation7 + $0x70] sm:$0xff]  }
 0x41e   :  { %1995 = vmatprep.subr.bf16.mxu0 %v2830_v42  ;;  %v2868_v42 = vld [vmem:[#allocation7 + $0x30] sm:$0xff]  }
 0x421   :  { %1996 = vmatpush1.bf16.msra.mxu0 %v2828_v43  ;;  %v2869_v43 = vld [vmem:[#allocation7 + $0x78] sm:$0xff]  }
 0x422   :  { %1997 = vmatprep.subr.bf16.mxu0 %v2833_v44  ;;  %v2870_v44 = vld [vmem:[#allocation7 + $0x38] sm:$0xff]  }
 0x425   :  { %1998 = vmatpush1.bf16.msra.mxu0 %v2831_v45  ;;  %v2420_v45 = vld [vmem:[%s3155_s6 + $0x8] sm:$0x3] }
 0x426   :  { %1999 = vmatprep.subr.bf16.mxu0 %v2836_v46  ;;  %v1814_v46 = vrot.slane %v2420_v45, %v3089_v5 }
 0x429   :  { %2000 = vmatpush1.bf16.msra.mxu0 %v2834_v47 }
 0x42a   :  { %2001 = vmatprep.subr.bf16.mxu0 %v2839_v48  ;;  %v1818_v48 = vrot.slane %v2420_v45, %v3094_v7  ;;  %v2453_v7 = vld [vmem:[%s3157_s8] ss:$0 sm:$0xff] }
 0x42d   :  { %2002 = vmatpush1.bf16.msra.mxu0 %v2837_v49 }
 0x42e   :  { %2003 = vmatprep.subr.bf16.mxu0 %v2842_v50 }
 0x431   :  { %2004 = vmatpush1.bf16.msra.mxu0 %v2840_v51 }
 0x432   :  { %2005 = vmatprep.subr.bf16.mxu0 %v2845_v52 }
 0x435   :  { %2006 = vmatpush1.bf16.msra.mxu0 %v2843_v53 }
 0x436   :  { %2007 = vmatprep.subr.bf16.mxu0 %v2848_v54 }
 0x439   :  { %2008 = vmatpush1.bf16.msra.mxu0 %v2846_v55 }
 0x43a   :  { %2009 = vmatprep.subr.bf16.mxu0 %v2851_v9 }
 0x43d   :  { %2010 = vmatpush1.bf16.msra.mxu0 %v2849_v10 }
 0x43e   :  { %2011 = vmatprep.subr.bf16.mxu0 %v2854_v11 }
 0x441   :  { %2012 = vmatpush1.bf16.msra.mxu0 %v2852_v12 }
 0x4d7   :  { %v1509_v58 = vpop.f32.mrb[4].mxu0 }
 0x4d8   :  { %v1511_v60 = vpop.f32.mrb[5].mxu0  ;;  %v1510_v62 = vadd.f32 %v1509_v58, %v1308_v57 }
 0x4d9   :  { %v1513_v61 = vpop.f32.mrb[6].mxu0  ;;  %v1512_v1 = vadd.f32 %v1511_v60, %v1312_v59 }
 0x4da   :  { %v1514_v63 = vadd.f32 %v1513_v61, %v1308_v57  ;;  %v1515_v0 = vpop.f32.mrb[7].mxu0 }
 0x4db   :  { %v1516_v2 = vadd.f32 %v1515_v0, %v1312_v59 }
 0x4dc   :  { %v1518_v3 = vpack.c.bf16 %v1514_v63, %v1510_v62 }
 0x4dd   :  { %v1519_v4 = vpack.c.bf16 %v1516_v2, %v1512_v1 }
 0x4de   :  { %v1520_v8 = vmax.bf16 %v2974_v22, %v1518_v3 }
 0x4df   :  { %v1521_v6 = vmax.bf16 %v2974_v22, %v1519_v4 }
 0x4e1   :  { %1760 = vmatprep.mubr.bf16.mxu1 %v1521_v6 }
 0x4e2   :  { %1761 = vmatmul.mubr.bf16.vlgmr.msra.gmra.mrb[16].mxu1 %v1520_v8 }
 0x4e3   :  { %2480 = vmatpush3.bf16.msra.mxu1 %v2856_v14 }
 0x4e4   :  { %2481 = vmatprep.subr.bf16.mxu1 %v2857_v15 }
 0x4e7   :  { %2482 = vmatpush3.bf16.msra.mxu1 %v2858_v16 }
 0x4e8   :  { %2483 = vmatprep.subr.bf16.mxu1 %v2859_v17 }
 0x4eb   :  { %2484 = vmatpush3.bf16.msra.mxu1 %v2860_v18 }
 0x4ec   :  { %2485 = vmatprep.subr.bf16.mxu1 %v2861_v19 }
 0x4ef   :  { %2486 = vmatpush3.bf16.msra.mxu1 %v2862_v20 }
 0x4f0   :  { %2487 = vmatprep.subr.bf16.mxu1 %v2863_v21 }
 0x4f3   :  { %2488 = vmatpush3.bf16.msra.mxu1 %v2864_v23 }
 0x4f4   :  { %2489 = vmatprep.subr.bf16.mxu1 %v2865_v24 }
 0x4f7   :  { %2490 = vmatpush3.bf16.msra.mxu1 %v2866_v40 }
 0x4f8   :  { %2491 = vmatprep.subr.bf16.mxu1 %v2867_v41 }
 0x4fb   :  { %2492 = vmatpush3.bf16.msra.mxu1 %v2868_v42 }
 0x4fc   :  { %2493 = vmatprep.subr.bf16.mxu1 %v2869_v43 }
 0x4ff   :  { %2494 = vmatpush3.bf16.msra.mxu1 %v2870_v44 }
 0x5b5   :  { %v1762_v27 = vpop.f32.mrb[16].mxu1 }
 0x5b6   :  { %v1764_v29 = vpop.f32.mrb[17].mxu1  ;;  %v1763_v31 = vadd.f32 %v1762_v27, %v1561_v26 }
 0x5b7   :  { %v1766_v30 = vpop.f32.mrb[18].mxu1  ;;  %v1765_v34 = vadd.f32 %v1764_v29, %v1565_v28 }
 0x5b8   :  { %v1767_v32 = vadd.f32 %v1766_v30, %v1561_v26  ;;  %v1768_v33 = vpop.f32.mrb[19].mxu1 }
 0x5b9   :  { %v1769_v35 = vadd.f32 %v1768_v33, %v1565_v28 }
 0x5ba   :  { %v1771_v36 = vpack.c.bf16 %v1767_v32, %v1763_v31 }
 0x5bb   :  { %v1772_v37 = vpack.c.bf16 %v1769_v35, %v1765_v34 }
 0x5bc   :  { %v1773_v39 = vmax.bf16 %v2974_v22, %v1771_v36 }
 0x5bd   :  { %v1774_v38 = vmax.bf16 %v2974_v22, %v1772_v37 }
 0x5bf   :  { %2013 = vmatprep.mubr.bf16.mxu0 %v1774_v38 }
 0x5c0   :  { %2014 = vmatmul.mubr.bf16.vlgmr.msra.gmra.mrb[8].mxu0 %v1773_v39 }
 0x693   :  { %v2015_v47 = vpop.f32.mrb[8].mxu0 }
 0x694   :  { %v2017_v49 = vpop.f32.mrb[9].mxu0  ;;  %v2016_v51 = vadd.f32 %v2015_v47, %v1814_v46 }
 0x695   :  { %v2019_v50 = vpop.f32.mrb[10].mxu0  ;;  %v2018_v54 = vadd.f32 %v2017_v49, %v1818_v48 }
 0x696   :  { %v2020_v52 = vadd.f32 %v2019_v50, %v1814_v46  ;;  %v2021_v53 = vpop.f32.mrb[11].mxu0 }
 0x697   :  { %v2022_v55 = vadd.f32 %v2021_v53, %v1818_v48 }
 0x698   :  { %v2024_v56 = vpack.c.bf16 %v2020_v52, %v2016_v51 }
 0x699   :  { %v2025_v57 = vpack.c.bf16 %v2022_v55, %v2018_v54 }
 0x69a   :  { %v2026_v59 = vmax.bf16 %v2974_v22, %v2024_v56 }
 0x69b   :  { %v2027_v58 = vmax.bf16 %v2974_v22, %v2025_v57 }
 0x69d   :  { %2195 = vmatprep.mubr.bf16.mxu1 %v2027_v58 }
 0x69e   :  { %2196 = vmatmul.mubr.bf16.vlgmr.msra.gmra.mrb[20].mxu1 %v2026_v59 }
 0x771   :  { %v2495_v60 = vpop.f32.mrb[20].mxu1 }
 0x772   :  { %v2496_v5 = vpop.f32.mrb[21].mxu1 }
 0x773   :  { %v2497_v61 = vadd.f32 %v2496_v5, %v2495_v60  ;;  %v2498_v62 = vpop.f32.mrb[22].mxu1 }
 0x774   :  { %v2499_v63 = vpop.f32.mrb[23].mxu1 }
 0x775   :  { %v2500_v0 = vadd.f32 %v2499_v63, %v2498_v62  ;;  %v2198_v1 = vadd.f32 %v2497_v61, %v2453_v7 }
 0x777   :  { %v2201_v2 = vadd.f32 %v2500_v0, %v2453_v7 }
 0x779   :  { %v2477_v3 = vpack.c.bf16 %v2201_v2, %v2198_v1 }
 0x77b   :  { %2478 = vst [vmem:[%s3158_s9] sm:$0xff] %v2477_v3  }
 0x77c   :  { %2218 = vsyncpa [#allocation3], 1 }
 0x77d   :  { %2219 = vsyncpa [#allocation5], 1 }
 0x77e   :  { %2220 = vsyncpa [#allocation8], 1 }

</bundles_post_ra>
